<compile_context>
chip_gen: v5e
topology: v5e:2x2
jax: 0.10.0
libtpu: 0.0.40
codegen_flags: <defaults>
</compile_context>

<pallas_src>
import functools
import math

import jax
import jax.numpy as jnp
from jax.experimental import pallas as pl
from jax.experimental.pallas import tpu as pltpu

_SCORE_LANES = 128  # lane-dense score slab width (cos -> lane 0, dot -> lane 1)


# ----------------------------------------------------------------------------
# Fused Matcher + StructureMapping kernel
# ----------------------------------------------------------------------------
def _fused_heads_kernel(x_ref, ty_ref, wm_ref, bm_ref, ws_ref, bs_ref,
                        scores_ref, smap_ref, *, inv_temperature, inv_sqrt_hd):
    # x_ref : (tm, n_hid)    ty_ref : (tm, n_out)
    # wm/ws : (n_hid, n_out) resident        bm/bs : (1, n_out)
    x = x_ref[...]                              # native dtype straight to MXU
    ty = ty_ref[...].astype(jnp.float32)

    # ---- Matcher head: tx = Linear(x)  (Dropout == identity in eval mode) ----
    tx = jnp.dot(x, wm_ref[...], preferred_element_type=jnp.float32)
    tx = tx + bm_ref[...].astype(jnp.float32)

    dot = jnp.sum(tx * ty, axis=-1, keepdims=True)          # (tm, 1)
    s_tx = jnp.sum(tx * tx, axis=-1, keepdims=True)
    s_ty = jnp.sum(ty * ty, axis=-1, keepdims=True)

    # torch CosineSimilarity: w12 / sqrt(max(w1 * w2, eps^2)), eps = 1e-8
    eps_sq = jnp.float32(1e-8 * 1e-8)
    denom_recip = jax.lax.rsqrt(jnp.maximum(s_tx * s_ty, eps_sq))

    cos_col = dot * denom_recip * jnp.float32(inv_temperature)   # use_norm=True
    dot_col = dot * jnp.float32(inv_sqrt_hd)                     # use_norm=False

    # lane-dense packed score slab: lane 0 = cosine path, lane 1 = dot path
    lane = jax.lax.broadcasted_iota(jnp.int32, scores_ref.shape, 1)
    scores_ref[...] = jnp.where(lane == 0, cos_col,
                                jnp.where(lane == 1, dot_col,
                                          jnp.float32(0.0)))

    # ---- StructureMapping head (Dropout == identity in eval mode) ----
    sm = jnp.dot(x, ws_ref[...], preferred_element_type=jnp.float32)
    smap_ref[...] = (sm + bs_ref[...].astype(jnp.float32)).astype(smap_ref.dtype)


def _pick_tm(n_rows, cap=512):
    """Largest row tile <= cap dividing n_rows, preferring a grid of >= 2."""
    best = None
    for tm in (512, 256, 128, 64, 32, 16, 8):
        if tm <= cap and n_rows % tm == 0:
            if n_rows // tm >= 2:
                return tm
            if best is None:
                best = tm
    return best if best is not None else n_rows


def pt_hgnn_heads_forward(x, ty, w_match, b_match, w_smap, b_smap,
                          *, temperature=0.1, tm=None):
    """Fused Matcher + StructureMapping forward pass.

    x        : [N, n_hid]    embeddings fed to Matcher.linear / StructureMapping
    ty       : [N, n_out]    Matcher's second argument
    w_match  : [n_hid, n_out] (nn.Linear weight pre-transposed), b_match: [1, n_out]
    w_smap   : [n_hid, n_out],                                   b_smap : [1, n_out]

    Returns (cos, dot, smap):
      cos  [N]         Matcher.forward(x, ty, use_norm=True)   (float32)
      dot  [N]         Matcher.forward(x, ty, use_norm=False)  (float32)
      smap [N, n_out]  StructureMapping.forward(x)             (x.dtype)
    """
    N, n_hid = x.shape
    n_out = w_match.shape[1]
    assert ty.shape == (N, n_out), (ty.shape, (N, n_out))
    if tm is None:
        tm = _pick_tm(N)
    assert N % tm == 0, (N, tm)

    # Uniform MXU operand dtype (bf16 stays bf16; f32 stays f32).
    w_match = w_match.astype(x.dtype)
    w_smap = w_smap.astype(x.dtype)

    kernel = functools.partial(
        _fused_heads_kernel,
        inv_temperature=1.0 / float(temperature),
        inv_sqrt_hd=1.0 / math.sqrt(n_out))

    itemsize = jnp.dtype(x.dtype).itemsize
    cost = pl.CostEstimate(
        flops=2 * 2 * N * n_hid * n_out + 8 * N * n_out,
        transcendentals=N,  # one rsqrt per row
        bytes_accessed=(x.size * itemsize
                        + ty.size * jnp.dtype(ty.dtype).itemsize
                        + (w_match.size + w_smap.size) * itemsize
                        + (b_match.size + b_smap.size) * 4
                        + N * _SCORE_LANES * 4
                        + N * n_out * itemsize))

    scores, smap = pl.pallas_call(
        kernel,
        out_shape=(jax.ShapeDtypeStruct((N, _SCORE_LANES), jnp.float32),
                   jax.ShapeDtypeStruct((N, n_out), x.dtype)),
        grid_spec=pltpu.PrefetchScalarGridSpec(
            num_scalar_prefetch=0,
            grid=(N // tm,),
            in_specs=[
                pl.BlockSpec((tm, n_hid), lambda i: (i, 0)),     # x tile
                pl.BlockSpec((tm, n_out), lambda i: (i, 0)),     # ty tile
                pl.BlockSpec((n_hid, n_out), lambda i: (0, 0)),  # W_match (resident)
                pl.BlockSpec((1, n_out), lambda i: (0, 0)),      # b_match
                pl.BlockSpec((n_hid, n_out), lambda i: (0, 0)),  # W_smap (resident)
                pl.BlockSpec((1, n_out), lambda i: (0, 0)),      # b_smap
            ],
            out_specs=[
                pl.BlockSpec((tm, _SCORE_LANES), lambda i: (i, 0)),  # packed scores
                pl.BlockSpec((tm, n_out), lambda i: (i, 0)),         # smap
            ],
        ),
        compiler_params=pltpu.CompilerParams(
            dimension_semantics=("parallel",),
            vmem_limit_bytes=32 * 1024 * 1024),
        cost_estimate=cost,
    )(x, ty, w_match, b_match, w_smap, b_smap)

    return scores[:, 0], scores[:, 1], smap


# ----------------------------------------------------------------------------
# Pure-JAX reference for correctness
# ----------------------------------------------------------------------------
def _reference(x, ty, wm, bm, ws, bs, temperature=0.1):
    x32 = x.astype(jnp.float32)
    ty32 = ty.astype(jnp.float32)
    tx = x32 @ wm.astype(jnp.float32) + bm.astype(jnp.float32)[0]
    dot = jnp.sum(tx * ty32, axis=-1)
    eps = 1e-8
    w1 = jnp.sum(tx * tx, axis=-1)
    w2 = jnp.sum(ty32 * ty32, axis=-1)
    cos = dot / jnp.sqrt(jnp.maximum(w1 * w2, eps * eps)) / temperature
    smap = x32 @ ws.astype(jnp.float32) + bs.astype(jnp.float32)[0]
    return cos, dot / math.sqrt(wm.shape[1]), smap.astype(x.dtype)


if __name__ == "__main__":
    key = jax.random.PRNGKey(0)
    n_hid = 32      # gnn.n_hid
    n_out = 32      # Matcher(n_hid, n_hid) / StructureMapping(n_hid, n_hid)
    N = 512         # number of (target, source) pairs; tm=256 -> grid of 2

    k1, k2, k3, k4, k5, k6 = jax.random.split(key, 6)

    # Deterministic synthetic parameters (PyTorch weight [n_out, n_hid] stored
    # already transposed to [n_hid, n_out]).
    w_match = jax.random.normal(k1, (n_hid, n_out), jnp.float32) / math.sqrt(n_hid)
    b_match = jax.random.normal(k2, (1, n_out), jnp.float32) * 0.01
    w_smap = jax.random.normal(k3, (n_hid, n_out), jnp.float32) / math.sqrt(n_hid)
    b_smap = jax.random.normal(k4, (1, n_out), jnp.float32) * 0.01

    # Example inputs: target embeddings (x) and source embeddings (ty).
    x = jax.random.normal(k5, (N, n_hid), jnp.float32)
    ty = jax.random.normal(k6, (N, n_out), jnp.float32)

    cos_out, dot_out, smap_out = pt_hgnn_heads_forward(
        x, ty, w_match, b_match, w_smap, b_smap, temperature=0.1)
    jax.block_until_ready((cos_out, dot_out, smap_out))

    cos_ref, dot_ref, smap_ref = _reference(x, ty, w_match, b_match,
                                            w_smap, b_smap, temperature=0.1)
    assert jnp.allclose(cos_out, cos_ref, atol=1e-4, rtol=1e-4)
    assert jnp.allclose(dot_out, dot_ref, atol=1e-4, rtol=1e-4)
    assert jnp.allclose(smap_out, smap_ref, atol=1e-4, rtol=1e-4)

    print("KERNEL_OK")
</pallas_src>

<mosaic_0001>
module attributes {stable_mosaic.version = 11 : i64} {
  func.func @_fused_heads_kernel(%arg0: i32, %arg1: memref<256x32xf32, #tpu.memory_space<vmem>>, %arg2: memref<256x32xf32, #tpu.memory_space<vmem>>, %arg3: memref<32x32xf32, #tpu.memory_space<vmem>>, %arg4: memref<1x32xf32, #tpu.memory_space<vmem>>, %arg5: memref<32x32xf32, #tpu.memory_space<vmem>>, %arg6: memref<1x32xf32, #tpu.memory_space<vmem>>, %arg7: memref<256x128xf32, #tpu.memory_space<vmem>>, %arg8: memref<256x32xf32, #tpu.memory_space<vmem>>) attributes {dimension_semantics = [#tpu.dimension_semantics<parallel>], iteration_bounds = array<i64: 2>, scalar_prefetch = 0 : i64, scratch_operands = 0 : i64, tpu.core_type = #tpu.core_type<tc>, window_params = [{transform_indices = @transform_0, window_bounds = array<i64: 256, 32>}, {transform_indices = @transform_1, window_bounds = array<i64: 256, 32>}, {pipeline_mode = #tpu.pipeline_mode<synchronous>, transform_indices = @transform_2, window_bounds = array<i64: 32, 32>}, {pipeline_mode = #tpu.pipeline_mode<synchronous>, transform_indices = @transform_3, window_bounds = array<i64: 1, 32>}, {pipeline_mode = #tpu.pipeline_mode<synchronous>, transform_indices = @transform_4, window_bounds = array<i64: 32, 32>}, {pipeline_mode = #tpu.pipeline_mode<synchronous>, transform_indices = @transform_5, window_bounds = array<i64: 1, 32>}, {transform_indices = @transform_6, window_bounds = array<i64: 256, 128>}, {transform_indices = @transform_7, window_bounds = array<i64: 256, 32>}]} {
    %c0 = arith.constant 0 : index
    %c0_0 = arith.constant 0 : index
    %0 = vector.load %arg1[%c0, %c0_0] : memref<256x32xf32, #tpu.memory_space<vmem>>, vector<256x32xf32>
    %c0_1 = arith.constant 0 : index
    %c0_2 = arith.constant 0 : index
    %1 = vector.load %arg2[%c0_1, %c0_2] : memref<256x32xf32, #tpu.memory_space<vmem>>, vector<256x32xf32>
    %c0_3 = arith.constant 0 : index
    %c0_4 = arith.constant 0 : index
    %2 = vector.load %arg3[%c0_3, %c0_4] : memref<32x32xf32, #tpu.memory_space<vmem>>, vector<32x32xf32>
    %cst = arith.constant dense<0.000000e+00> : vector<256x32xf32>
    %3 = tpu.matmul %0, %2, %cst {dimension_numbers = #tpu.dot_dimension_numbers<[1], [0], [0], [1], [0, 0, 1, 1], [], []>} : vector<256x32xf32>, vector<32x32xf32>, vector<256x32xf32> -> vector<256x32xf32>
    %c0_5 = arith.constant 0 : index
    %c0_6 = arith.constant 0 : index
    %4 = vector.load %arg4[%c0_5, %c0_6] : memref<1x32xf32, #tpu.memory_space<vmem>>, vector<1x32xf32>
    %5 = vector.broadcast %4 : vector<1x32xf32> to vector<256x32xf32>
    %6 = arith.addf %3, %5 : vector<256x32xf32>
    %7 = arith.mulf %6, %1 : vector<256x32xf32>
    %cst_7 = arith.constant dense<0.000000e+00> : vector<256xf32>
    %8 = vector.multi_reduction <add>, %7, %cst_7 [1] : vector<256x32xf32> to vector<256xf32>
    %9 = vector.shape_cast %8 : vector<256xf32> to vector<256x1xf32>
    %10 = arith.mulf %6, %6 : vector<256x32xf32>
    %cst_8 = arith.constant dense<0.000000e+00> : vector<256xf32>
    %11 = vector.multi_reduction <add>, %10, %cst_8 [1] : vector<256x32xf32> to vector<256xf32>
    %12 = vector.shape_cast %11 : vector<256xf32> to vector<256x1xf32>
    %13 = arith.mulf %1, %1 : vector<256x32xf32>
    %cst_9 = arith.constant dense<0.000000e+00> : vector<256xf32>
    %14 = vector.multi_reduction <add>, %13, %cst_9 [1] : vector<256x32xf32> to vector<256xf32>
    %15 = vector.shape_cast %14 : vector<256xf32> to vector<256x1xf32>
    %16 = arith.mulf %12, %15 : vector<256x1xf32>
    %cst_10 = arith.constant 1.000000e-16 : f32
    %17 = vector.broadcast %cst_10 : f32 to vector<256x1xf32>
    %18 = arith.maximumf %16, %17 : vector<256x1xf32>
    %19 = math.rsqrt %18 : vector<256x1xf32>
    %20 = arith.mulf %9, %19 : vector<256x1xf32>
    %cst_11 = arith.constant 1.000000e+01 : f32
    %21 = vector.broadcast %cst_11 : f32 to vector<256x1xf32>
    %22 = arith.mulf %20, %21 : vector<256x1xf32>
    %cst_12 = arith.constant 0.176776692 : f32
    %23 = vector.broadcast %cst_12 : f32 to vector<256x1xf32>
    %24 = arith.mulf %9, %23 : vector<256x1xf32>
    %25 = tpu.iota {dimensions = array<i32: 1>} : vector<256x128xi32>
    %c0_i32 = arith.constant 0 : i32
    %26 = vector.broadcast %c0_i32 : i32 to vector<256x128xi32>
    %27 = arith.cmpi eq, %25, %26 : vector<256x128xi32>
    %c1_i32 = arith.constant 1 : i32
    %28 = vector.broadcast %c1_i32 : i32 to vector<256x128xi32>
    %29 = arith.cmpi eq, %25, %28 : vector<256x128xi32>
    %cst_13 = arith.constant 0.000000e+00 : f32
    %30 = vector.shape_cast %24 : vector<256x1xf32> to vector<256x1xf32>
    %31 = vector.broadcast %30 : vector<256x1xf32> to vector<256x128xf32>
    %32 = vector.broadcast %cst_13 : f32 to vector<256x128xf32>
    %33 = arith.select %29, %31, %32 : vector<256x128xi1>, vector<256x128xf32>
    %34 = vector.shape_cast %22 : vector<256x1xf32> to vector<256x1xf32>
    %35 = vector.broadcast %34 : vector<256x1xf32> to vector<256x128xf32>
    %36 = arith.select %27, %35, %33 : vector<256x128xi1>, vector<256x128xf32>
    %c0_14 = arith.constant 0 : index
    %c0_15 = arith.constant 0 : index
    %37 = vector.load %arg7[%c0_14, %c0_15] : memref<256x128xf32, #tpu.memory_space<vmem>>, vector<256x128xf32>
    tpu.vector_store %arg7[%c0_14, %c0_15], %36 {strides = array<i32>} : memref<256x128xf32, #tpu.memory_space<vmem>>, vector<256x128xf32>,
    %c0_16 = arith.constant 0 : index
    %c0_17 = arith.constant 0 : index
    %38 = vector.load %arg5[%c0_16, %c0_17] : memref<32x32xf32, #tpu.memory_space<vmem>>, vector<32x32xf32>
    %cst_18 = arith.constant dense<0.000000e+00> : vector<256x32xf32>
    %39 = tpu.matmul %0, %38, %cst_18 {dimension_numbers = #tpu.dot_dimension_numbers<[1], [0], [0], [1], [0, 0, 1, 1], [], []>} : vector<256x32xf32>, vector<32x32xf32>, vector<256x32xf32> -> vector<256x32xf32>
    %c0_19 = arith.constant 0 : index
    %c0_20 = arith.constant 0 : index
    %40 = vector.load %arg6[%c0_19, %c0_20] : memref<1x32xf32, #tpu.memory_space<vmem>>, vector<1x32xf32>
    %41 = vector.broadcast %40 : vector<1x32xf32> to vector<256x32xf32>
    %42 = arith.addf %39, %41 : vector<256x32xf32>
    %c0_21 = arith.constant 0 : index
    %c0_22 = arith.constant 0 : index
    %43 = vector.load %arg8[%c0_21, %c0_22] : memref<256x32xf32, #tpu.memory_space<vmem>>, vector<256x32xf32>
    tpu.vector_store %arg8[%c0_21, %c0_22], %42 {strides = array<i32>} : memref<256x32xf32, #tpu.memory_space<vmem>>, vector<256x32xf32>,
    return
  }
  func.func @transform_0(%arg0: i32) -> (i32, i32) {
    %c0_i32 = arith.constant 0 : i32
    %c0_i32_0 = arith.constant 0 : i32
    return %arg0, %c0_i32 : i32, i32
  }
  func.func @transform_1(%arg0: i32) -> (i32, i32) {
    %c0_i32 = arith.constant 0 : i32
    %c0_i32_0 = arith.constant 0 : i32
    return %arg0, %c0_i32 : i32, i32
  }
  func.func @transform_2(%arg0: i32) -> (i32, i32) {
    %c0_i32 = arith.constant 0 : i32
    %c0_i32_0 = arith.constant 0 : i32
    %c0_i32_1 = arith.constant 0 : i32
    return %c0_i32, %c0_i32_0 : i32, i32
  }
  func.func @transform_3(%arg0: i32) -> (i32, i32) {
    %c0_i32 = arith.constant 0 : i32
    %c0_i32_0 = arith.constant 0 : i32
    %c0_i32_1 = arith.constant 0 : i32
    return %c0_i32, %c0_i32_0 : i32, i32
  }
  func.func @transform_4(%arg0: i32) -> (i32, i32) {
    %c0_i32 = arith.constant 0 : i32
    %c0_i32_0 = arith.constant 0 : i32
    %c0_i32_1 = arith.constant 0 : i32
    return %c0_i32, %c0_i32_0 : i32, i32
  }
  func.func @transform_5(%arg0: i32) -> (i32, i32) {
    %c0_i32 = arith.constant 0 : i32
    %c0_i32_0 = arith.constant 0 : i32
    %c0_i32_1 = arith.constant 0 : i32
    return %c0_i32, %c0_i32_0 : i32, i32
  }
  func.func @transform_6(%arg0: i32) -> (i32, i32) {
    %c0_i32 = arith.constant 0 : i32
    %c0_i32_0 = arith.constant 0 : i32
    return %arg0, %c0_i32 : i32, i32
  }
  func.func @transform_7(%arg0: i32) -> (i32, i32) {
    %c0_i32 = arith.constant 0 : i32
    %c0_i32_0 = arith.constant 0 : i32
    return %arg0, %c0_i32 : i32, i32
  }
}

</mosaic_0001>

<bundles_post_ra>
// kernel: tpu_custom_call.1
= control target key start
LH: loop header
LB: loop body
LE: loop exit
PB: predicated region body
PF: predicated region fallthrough
CT: control target
= control target key end

     0   :  { %13 = vsyncpa [#allocation3], 0  ;;  %s3506_s0 = inlined_call_operand.vmem [shape: f32[512,32], index: 0, kind: input, shape index: {}]   ;;  %s3507_s1 = inlined_call_operand.vmem [shape: f32[512,32], index: 1, kind: input, shape index: {}]   ;;  %s3508_s2 = inlined_call_operand.vmem [shape: f32[32,32], index: 2, kind: input, shape index: {}]   ;;  %s3509_s3 = inlined_call_operand.vmem [shape: f32[1,32], index: 3, kind: input, shape index: {}]   ;;  %s3510_s4 = inlined_call_operand.vmem [shape: f32[32,32], index: 4, kind: input, shape index: {}]   ;;  %s3511_s5 = inlined_call_operand.vmem [shape: f32[1,32], index: 5, kind: input, shape index: {}]   ;;  %s3512_s6 = inlined_call_operand.hbm [shape: f32[512,128], index: 6, kind: output, shape index: {0}]   ;;  %s3513_s7 = inlined_call_operand.vmem [shape: f32[512,32], index: 7, kind: output, shape index: {1}]  }
   0x1   :  { %15 = vsyncpa [#allocation3 + $0x1], 0  ;;  %s2142_s24 = smov 0   ;;  %s2144_s25 = smov 0  }
   0x2   :  { %s2146_s26 = smov 0   ;;  %s2148_s27 = smov 0  }
   0x3 LB: > { %s2163_s28 = sadd.s32 4294967295, %s2098_s27   ;;  %s1839_s29 = sadd.s32 4294967294, %s2098_s27   ;;  %s2098_s27 = sphi %s2148_s27, %s3556_s27   ;;  %s2094_s26 = sphi %s2146_s26, %s3555_s26   ;;  %s2090_s25 = sphi %s2144_s25, %s3554_s25   ;;  %s2086_s24 = sphi %s2142_s24, %s3553_s24  }
   0x4   : > { %s2167_s30 = sadd.s32 1, %s2098_s27   ;;  %s164_s8 = sadd.s32 1, %s2094_s26 }
   0x5   : > { %s161_s9 = ssub.s32 %s2098_s27, %s2167_s30  ;;  %p174_p0 = scmp.ne.s32.totalorder %s2094_s26, %s2090_s25 }
   0x6   : > { %p162_p1 = scmp.eq.s32.totalorder %s161_s9, 0  ;;  %p175_p2 = scmp.eq.s32.totalorder %s2163_s28, 1 }
   0x7   : > { %p180_p3 = scmp.ne.s32.totalorder %s2090_s25, %s2086_s24  ;;  %p181_p4 = scmp.eq.s32.totalorder %s1839_s29, 1 }
   0x8   : > { %s2178_s10 = scalar_select %p162_p1, %s2094_s26, %s164_s8  }
   0x9   : > { %p2180_p5 = por %p175_p2, %p174_p0  ;;  %p2184_p6 = por %p181_p4, %p180_p3 }
   0xa   : > { %p1842_p7 = scmp.ge.s32.totalorder %s2098_s27, 1  ;;  %p255_p8 = scmp.lt.s32.totalorder %s2098_s27, 3 }
   0xc   : > { %p256_p9 = pnand %p1842_p7, %p255_p8 }
   0xe   : > { %259 = sbr.rel (%p256_p9) target bundleno = 481 (0x1e1), region = 44 }
  0x13   : > { %v383_v0 = vld [vmem:[%s3508_s2 + $0x18] sm:$0xff]  ;;  %v382_v1 = vld [vmem:[%s3508_s2 + $0x10] sm:$0xff]  ;;  %s1844_s17 = sshll.u32 %s2163_s28, 5  ;;  %v381_v2 = vld [vmem:[%s3508_s2 + $0x8] sm:$0xff]  ;;  %vm388_vm0 = vcmask 261120   ;;  %s287_s9 = sand.u32 1, %s2090_s25  }
  0x14   : > { %497 = vmatpush.msra.mxu0 %v383_v0  ;;  %1920 = vmatpush.msra.mxu2 %v383_v0  ;;  %p298_p10 = scmp.lt.s32.totalorder %s1844_s17, 63  ;;  %v380_v3 = vld [vmem:[%s3508_s2] sm:$0xff]  ;;  %s2818_s13 = sshll.u32 %s287_s9, 8 }
  0x15   : > { %s2855_s15 = scalar_lea.vmem [#allocation2], %s2818_s13  ;;  %s1919_s21 = sshll.u32 %s2163_s28, 8 }
  0x16   : > { %498 = vmatpush.msra.mxu0 %v382_v1  ;;  %1921 = vmatpush.msra.mxu2 %v382_v1  ;;  %s3558_s17 = smov (!%p298_p10, %s1844_s17), 63  ;;  %s1733_s28 = sshll.u32 %s2855_s15, 4  ;;  %s1734_s28 = int_to_ptr.vmem [resolvable:$true] %s1733_s28 }
  0x17   : > { %s2203_s22 = sshll.u32 %s3558_s17, 3 }
  0x18   : > { %499 = vmatpush.msra.mxu0 %v381_v2  ;;  %1922 = vmatpush.msra.mxu2 %v381_v2  ;;  %s2209_s8 = scalar_lea.vmem %s3506_s0, %s2203_s22  ;;  %s2231_s14 = scalar_lea.vmem %s3507_s1, %s2203_s22 }
  0x19   : > { %v2212_v4 = vld [vmem:[%s2209_s8] sm:$0xff]  ;;  %v2222_v6 = vld [vmem:[%s2209_s8 + $0x88] sm:$0xff]  ;;  %v2248_v12 = vld [vmem:[%s2231_s14 + $0x10] sm:$0xff]  ;;  %s3013_s19 = scalar_lea.vmem %s3513_s7, %s2203_s22  ;;  %s2056_s22 = scalar_lea.hbm %s3512_s6, 512 }
  0x1a   : > { %500 = vmatpush.msra.mxu0 %v380_v3  ;;  %1923 = vmatpush.msra.mxu2 %v380_v3  ;;  %v2215_v5 = vld [vmem:[%s2209_s8 + $0x80] sm:$0xff]  ;;  %v2225_v7 = vld [vmem:[%s2209_s8 + $0x8] sm:$0xff]  ;;  %v856_v13 = vmul.f32 %v2248_v12, %v2248_v12  ;;  %v2259_v18 = vld [vmem:[%s2209_s8 + $0x90] sm:$0xff] }
  0x1b   : > { %1850 = vmatmul.msk.f32.vlgmr.msra.gmra.mxu0 %vm388_vm0, %v2212_v4  ;;  %1866 = vmatmul.msk.f32.vlgmr.msra.gmra.mxu2 %vm388_vm0, %v2215_v5  ;;  %v2238_v8 = vld [vmem:[%s2231_s14 + $0x8] sm:$0xff]  ;;  %v2241_v9 = vld [vmem:[%s2231_s14] sm:$0xff]  ;;  %v2262_v19 = vld [vmem:[%s2209_s8 + $0x10] sm:$0xff] }
  0x1c   : > { %v855_v10 = vmul.f32 %v2238_v8, %v2238_v8  ;;  %v854_v11 = vmul.f32 %v2241_v9, %v2241_v9  ;;  %v2253_v14 = vld [vmem:[%s2231_s14 + $0x20] sm:$0xff]  ;;  %v892_v17 = vsel %vm388_vm0, %v856_v13, 0.0  ;;  %v2271_v21 = vld [vmem:[%s2231_s14 + $0x18] sm:$0xff]  ;;  %v2274_v22 = vld [vmem:[%s2231_s14 + $0x28] sm:$0xff] }
  0x1d   : > { %893 = vadd.xlane.f32.xlu0 %v892_v17  ;;  %v858_v20 = vmul.f32 %v2253_v14, %v2253_v14  ;;  %v857_v24 = vmul.f32 %v2271_v21, %v2271_v21  ;;  %v859_v25 = vmul.f32 %v2274_v22, %v2274_v22  ;;  %v2282_v26 = vld [vmem:[%s2231_s14 + $0x38] sm:$0xff]  ;;  %v2299_v32 = vld [vmem:[%s2231_s14 + $0x30] sm:$0xff]  ;;  %v2302_v33 = vld [vmem:[%s2231_s14 + $0x40] sm:$0xff] }
  0x1e   : > { %v889_v15 = vsel %vm388_vm0, %v855_v10, 0.0  ;;  %v886_v16 = vsel %vm388_vm0, %v854_v11, 0.0  ;;  %v2287_v29 = vld [vmem:[%s2209_s8 + $0x18] sm:$0xff]  ;;  %v861_v31 = vmul.f32 %v2282_v26, %v2282_v26  ;;  %v860_v35 = vmul.f32 %v2299_v32, %v2299_v32  ;;  %v2310_v37 = vld [vmem:[%s2231_s14 + $0x50] sm:$0xff]  ;;  %v2313_v38 = vld [vmem:[%s2231_s14 + $0x48] sm:$0xff] }
  0x1f   : > { %890 = vadd.xlane.f32.xlu2 %v889_v15  ;;  %887 = vadd.xlane.f32.xlu1 %v886_v16  ;;  %v898_v23 = vsel %vm388_vm0, %v858_v20, 0.0  ;;  %v895_v27 = vsel %vm388_vm0, %v857_v24, 0.0  ;;  %v901_v28 = vsel %vm388_vm0, %v859_v25, 0.0  ;;  %v2290_v30 = vld [vmem:[%s2209_s8 + $0x98] sm:$0xff]  ;;  %v862_v36 = vmul.f32 %v2302_v33, %v2302_v33  ;;  %v2318_v41 = vld [vmem:[%s2209_s8 + $0x20] sm:$0xff]  ;;  %v2339_v49 = vld [vmem:[%s2231_s14 + $0x68] sm:$0xff] }
  0x20   : > { %v907_v34 = vsel %vm388_vm0, %v861_v31, 0.0  ;;  %v904_v39 = vsel %vm388_vm0, %v860_v35, 0.0  ;;  %v2321_v42 = vld [vmem:[%s2209_s8 + $0xa0] sm:$0xff]  ;;  %v864_v43 = vmul.f32 %v2310_v37, %v2310_v37  ;;  %v863_v44 = vmul.f32 %v2313_v38, %v2313_v38  ;;  %v2332_v45 = vld [vmem:[%s2231_s14 + $0x58] sm:$0xff]  ;;  %3527 = vst [vmem:[#allocation5_spill] sm:$0xff] %v2339_v49  ;;  %v2346_v52 = vld [vmem:[%s2231_s14 + $0x70] sm:$0xff] }
  0x21   : > { %v910_v40 = vsel %vm388_vm0, %v862_v36, 0.0  ;;  %v865_v48 = vmul.f32 %v2332_v45, %v2332_v45  ;;  %v2342_v50 = vld [vmem:[%s2231_s14 + $0x60] sm:$0xff]  ;;  %3528 = vst [vmem:[#allocation6_spill] sm:$0xff] %v2346_v52  ;;  %v2349_v53 = vld [vmem:[%s2209_s8 + $0xa8] sm:$0xff]  ;;  %v867_v55 = vmul.f32 %v2339_v49, %v2339_v49  ;;  %v868_v57 = vmul.f32 %v2346_v52, %v2346_v52  ;;  %v2371_v62 = vld [vmem:[%s2231_s14 + $0x78] sm:$0xff] }
  0x22   : > { %v916_v46 = vsel %vm388_vm0, %v864_v43, 0.0  ;;  %v913_v47 = vsel %vm388_vm0, %v863_v44, 0.0  ;;  %v2352_v54 = vld [vmem:[%s2209_s8 + $0x28] sm:$0xff]  ;;  %v866_v56 = vmul.f32 %v2342_v50, %v2342_v50  ;;  %v2368_v61 = vld [vmem:[%s2231_s14 + $0x80] sm:$0xff]  ;;  %3529 = vst [vmem:[#allocation7_spill] sm:$0xff] %v2371_v62  ;;  %v2377_v0 = vld [vmem:[%s2209_s8 + $0x30] sm:$0xff]  ;;  %v869_v3 = vmul.f32 %v2371_v62, %v2371_v62 }
  0x23   : > { %1867 = vmatmul.msk.f32.gmra.mxu2 %vm388_vm0, %v2222_v6  ;;  %1851 = vmatmul.msk.f32.gmra.mxu0 %vm388_vm0, %v2225_v7  ;;  %v919_v51 = vsel %vm388_vm0, %v865_v48, 0.0  ;;  %v925_v58 = vsel %vm388_vm0, %v867_v55, 0.0  ;;  %v928_v60 = vsel %vm388_vm0, %v868_v57, 0.0  ;;  %v2374_v63 = vld [vmem:[%s2231_s14 + $0x88] sm:$0xff]  ;;  %v2380_v1 = vld [vmem:[%s2209_s8 + $0xb0] sm:$0xff]  ;;  %v870_v2 = vmul.f32 %v2368_v61, %v2368_v61  ;;  %v2396_v16 = vld [vmem:[%s2231_s14 + $0x98] sm:$0xff] }
  0x24   : > { %v922_v59 = vsel %vm388_vm0, %v866_v56, 0.0  ;;  %v871_v10 = vmul.f32 %v2374_v63, %v2374_v63  ;;  %v931_v13 = vsel %vm388_vm0, %v869_v3, 0.0  ;;  %v2399_v17 = vld [vmem:[%s2231_s14 + $0x90] sm:$0xff]  ;;  %v2402_v20 = vld [vmem:[%s2231_s14 + $0xa0] sm:$0xff]  ;;  %v2408_v24 = vld [vmem:[%s2209_s8 + $0x38] sm:$0xff]  ;;  %v873_v25 = vmul.f32 %v2396_v16, %v2396_v16 }
  0x25   : > { %902 = vadd.xlane.f32.xlu0 %v901_v28  ;;  %v934_v11 = vsel %vm388_vm0, %v870_v2, 0.0  ;;  %v874_v28 = vmul.f32 %v2402_v20, %v2402_v20  ;;  %v2424_v36 = vld [vmem:[%s2231_s14 + $0xb0] sm:$0xff]  ;;  %v2433_v43 = vld [vmem:[%s2209_s8 + $0xc0] sm:$0xff]  ;;  %v2452_v57 = vld [vmem:[%s2231_s14 + $0xc8] sm:$0xff] }
  0x26   : > { %v937_v15 = vsel %vm388_vm0, %v871_v10, 0.0  ;;  %v943_v31 = vsel %vm388_vm0, %v873_v25, 0.0  ;;  %v2436_v44 = vld [vmem:[%s2209_s8 + $0x40] sm:$0xff]  ;;  %v2464_v2 = vld [vmem:[%s2209_s8 + $0xc8] sm:$0xff]  ;;  %v879_v3 = vmul.f32 %v2452_v57, %v2452_v57 }
  0x27   : > { %899 = vadd.xlane.f32.xlu2 %v898_v23  ;;  %896 = vadd.xlane.f32.xlu1 %v895_v27  ;;  %v2405_v23 = vld [vmem:[%s2209_s8 + $0xb8] sm:$0xff]  ;;  %v872_v27 = vmul.f32 %v2399_v17, %v2399_v17  ;;  %v946_v35 = vsel %vm388_vm0, %v874_v28, 0.0  ;;  %v2483_v28 = vld [vmem:[%s2209_s8 + $0xd0] sm:$0xff] }
  0x2b   : > { %1868 = vmatmul.msk.f32.gmra.mxu2 %vm388_vm0, %v2259_v18  ;;  %1852 = vmatmul.msk.f32.gmra.mxu0 %vm388_vm0, %v2262_v19 }
  0x2d   : > { %911 = vadd.xlane.f32.xlu0 %v910_v40  ;;  %v2430_v40 = vld [vmem:[%s2231_s14 + $0xb8] sm:$0xff] }
  0x2e   : > { %v877_v48 = vmul.f32 %v2430_v40, %v2430_v40 }
  0x2f   : > { %908 = vadd.xlane.f32.xlu2 %v907_v34  ;;  %905 = vadd.xlane.f32.xlu1 %v904_v39  ;;  %v940_v34 = vsel %vm388_vm0, %v872_v27, 0.0  ;;  %v2427_v39 = vld [vmem:[%s2231_s14 + $0xa8] sm:$0xff]  ;;  %v2480_v27 = vld [vmem:[%s2231_s14 + $0xe0] sm:$0xff] }
  0x30   : > { %v955_v56 = vsel %vm388_vm0, %v877_v48, 0.0  ;;  %v2506_v48 = vld [vmem:[%s2231_s14 + $0xd8] sm:$0xff] }
  0x33   : > { %1853 = vmatmul.msk.f32.gmra.mxu0 %vm388_vm0, %v2287_v29  ;;  %1869 = vmatmul.msk.f32.gmra.mxu2 %vm388_vm0, %v2290_v30 }
  0x35   : > { %920 = vadd.xlane.f32.xlu0 %v919_v51 }
  0x37   : > { %917 = vadd.xlane.f32.xlu2 %v916_v46  ;;  %914 = vadd.xlane.f32.xlu1 %v913_v47  ;;  %v876_v46 = vmul.f32 %v2424_v36, %v2424_v36  ;;  %v875_v47 = vmul.f32 %v2427_v39, %v2427_v39 }
  0x39   : > { %v952_v51 = vsel %vm388_vm0, %v876_v46, 0.0  ;;  %v949_v55 = vsel %vm388_vm0, %v875_v47, 0.0  ;;  %v2496_v46 = vld [vmem:[%s2209_s8 + $0xd8] sm:$0xff] }
  0x3a   : > { %v2499_v47 = vld [vmem:[%s2209_s8 + $0x58] sm:$0xff] }
  0x3b   : > { %1854 = vmatmul.msk.f32.gmra.mxu0 %vm388_vm0, %v2318_v41  ;;  %1870 = vmatmul.msk.f32.gmra.mxu2 %vm388_vm0, %v2321_v42 }
  0x3d   : > { %929 = vadd.xlane.f32.xlu0 %v928_v60  ;;  %v2461_v60 = vld [vmem:[%s2209_s8 + $0x48] sm:$0xff] }
  0x3f   : > { %926 = vadd.xlane.f32.xlu2 %v925_v58  ;;  %923 = vadd.xlane.f32.xlu1 %v922_v59  ;;  %v2455_v58 = vld [vmem:[%s2231_s14 + $0xc0] sm:$0xff]  ;;  %v2458_v59 = vld [vmem:[%s2231_s14 + $0xd0] sm:$0xff] }
  0x40   : > { %v878_v10 = vmul.f32 %v2455_v58, %v2455_v58 }
  0x43   : > { %1871 = vmatmul.msk.f32.gmra.mxu2 %vm388_vm0, %v2349_v53  ;;  %1855 = vmatmul.msk.f32.gmra.mxu0 %vm388_vm0, %v2352_v54 }
  0x45   : > { %938 = vadd.xlane.f32.xlu0 %v937_v15  ;;  %v958_v15 = vsel %vm388_vm0, %v878_v10, 0.0  ;;  %v2522_v10 = vld [vmem:[%s2209_s8 + $0xe8] sm:$0xff] }
  0x46   : > { %3532 = vst [vmem:[#allocation10_spill] sm:$0xff] %v2522_v10 }
  0x47   : > { %935 = vadd.xlane.f32.xlu2 %v934_v11  ;;  %932 = vadd.xlane.f32.xlu1 %v931_v13  ;;  %v880_v11 = vmul.f32 %v2458_v59, %v2458_v59  ;;  %v961_v13 = vsel %vm388_vm0, %v879_v3, 0.0 }
  0x49   : > { %v964_v25 = vsel %vm388_vm0, %v880_v11, 0.0  ;;  %v2527_v11 = vld [vmem:[%s2209_s8 + $0x68] sm:$0xff] }
  0x4a   : > { %3533 = vst [vmem:[#allocation11_spill] sm:$0xff] %v2527_v11 }
  0x4b   : > { %1856 = vmatmul.msk.f32.gmra.mxu0 %vm388_vm0, %v2377_v0  ;;  %1872 = vmatmul.msk.f32.gmra.mxu2 %vm388_vm0, %v2380_v1 }
  0x4d   : > { %947 = vadd.xlane.f32.xlu0 %v946_v35 }
  0x4f   : > { %944 = vadd.xlane.f32.xlu2 %v943_v31  ;;  %941 = vadd.xlane.f32.xlu1 %v940_v34  ;;  %v2486_v31 = vld [vmem:[%s2209_s8 + $0x50] sm:$0xff]  ;;  %v882_v34 = vmul.f32 %v2480_v27, %v2480_v27 }
  0x51   : > { %v970_v35 = vsel %vm388_vm0, %v882_v34, 0.0  ;;  %v2547_v34 = vld [vmem:[%s2209_s8 + $0x78] sm:$0xff] }
  0x52   : > { %3536 = vst [vmem:[#allocation14_spill] sm:$0xff] %v2547_v34 }
  0x53   : > { %1873 = vmatmul.msk.f32.gmra.mxu2 %vm388_vm0, %v2405_v23  ;;  %1857 = vmatmul.msk.f32.gmra.mxu0 %vm388_vm0, %v2408_v24 }
  0x55   : > { %956 = vadd.xlane.f32.xlu0 %v955_v56  ;;  %v881_v56 = vmul.f32 %v2506_v48, %v2506_v48 }
  0x57   : > { %953 = vadd.xlane.f32.xlu2 %v952_v51  ;;  %950 = vadd.xlane.f32.xlu1 %v949_v55  ;;  %v2509_v51 = vld [vmem:[%s2209_s8 + $0x60] sm:$0xff]  ;;  %v967_v3 = vsel %vm388_vm0, %v881_v56, 0.0 }
  0x58   : > { %3530 = vst [vmem:[#allocation8_spill] sm:$0xff] %v2509_v51  ;;  %v2512_v55 = vld [vmem:[%s2209_s8 + $0xe0] sm:$0xff] }
  0x59   : > { %3531 = vst [vmem:[#allocation9_spill] sm:$0xff] %v2512_v55 }
  0x5b   : > { %1874 = vmatmul.msk.f32.gmra.mxu2 %vm388_vm0, %v2433_v43  ;;  %1858 = vmatmul.msk.f32.gmra.mxu0 %vm388_vm0, %v2436_v44 }
  0x5d   : > { %965 = vadd.xlane.f32.xlu0 %v964_v25  ;;  %v2544_v25 = vld [vmem:[%s3509_s3] ss:$0 sm:$0xff] }
  0x5f   : > { %962 = vadd.xlane.f32.xlu2 %v961_v13  ;;  %959 = vadd.xlane.f32.xlu1 %v958_v15  ;;  %v2532_v13 = vld [vmem:[%s2209_s8 + $0xf0] sm:$0xff] }
  0x60   : > { %3534 = vst [vmem:[#allocation12_spill] sm:$0xff] %v2532_v13  ;;  %v2537_v15 = vld [vmem:[%s2209_s8 + $0x70] sm:$0xff] }
  0x61   : > { %3535 = vst [vmem:[#allocation13_spill] sm:$0xff] %v2537_v15 }
  0x63   : > { %1859 = vmatmul.msk.f32.gmra.mxu0 %vm388_vm0, %v2461_v60  ;;  %1875 = vmatmul.msk.f32.gmra.mxu2 %vm388_vm0, %v2464_v2 }
  0x67   : > { %971 = vadd.xlane.f32.xlu2 %v970_v35  ;;  %968 = vadd.xlane.f32.xlu1 %v967_v3  ;;  %v2550_v35 = vld [vmem:[%s2209_s8 + $0xf8] sm:$0xff]  ;;  %s1732_s8 = scalar_lea.hbm %s3512_s6, %s1919_s21 }
  0x68   : > { %3537 = vst [vmem:[#allocation15_spill] sm:$0xff] %v2550_v35  ;;  %s1735_s13 = sshll.u32 %s1732_s8, 4  ;;  %s1736_s13 = int_to_ptr.hbm [resolvable:$true] %s1735_s13 }
  0x69   : > { %s2050_s16 = sshra.s32 %s1736_s13, 4  ;;  %s2051_s16 = int_to_ptr.hbm [resolvable:$true] %s2050_s16 }
  0x6a   : > { %s2052_s17 = scalar_lea.hbm %s2051_s16, 256  ;;  %p2057_p0 = scmp.lt.s32.totalorder %s2051_s16, %s3512_s6 }
  0x6b   : > { %1876 = vmatmul.msk.f32.gmra.mxu2 %vm388_vm0, %v2483_v28  ;;  %1860 = vmatmul.msk.f32.gmra.mxu0 %vm388_vm0, %v2486_v31  ;;  %p2053_p11 = scmp.ne.s32.totalorder %s2051_s16, %s2052_s17  ;;  %p2058_p1 = scmp.lt.s32.totalorder %s2056_s22, %s2052_s17 }
  0x6d   : > { %p2054_p12 = pnand %p2053_p11, %p2180_p5  ;;  %p2059_p2 = por %p2058_p1, %p2057_p0 }
  0x6f   : > { %p2055_p13 = pneg %p2054_p12 }
  0x71   : > { %p2060_p3 = pnand %p2059_p2, %p2055_p13 }
  0x73   : > { %1877 = vmatmul.msk.f32.gmra.mxu2 %vm388_vm0, %v2496_v46  ;;  %1861 = vmatmul.msk.f32.gmra.mxu0 %vm388_vm0, %v2499_v47 }
  0x7b   : > { %1862 = vmatmul.msk.f32.gmra.mxu0 %vm388_vm0, %v2509_v51  ;;  %1878 = vmatmul.msk.f32.gmra.mxu2 %vm388_vm0, %v2512_v55 }
  0x83   : > { %1879 = vmatmul.msk.f32.gmra.mxu2 %vm388_vm0, %v2522_v10  ;;  %1863 = vmatmul.msk.f32.gmra.mxu0 %vm388_vm0, %v2527_v11 }
  0x8b   : > { %1880 = vmatmul.msk.f32.gmra.mxu2 %vm388_vm0, %v2532_v13  ;;  %1864 = vmatmul.msk.f32.gmra.mxu0 %vm388_vm0, %v2537_v15 }
  0x93   : > { %1881 = vmatmul.msk.f32.gmra.mxu2 %vm388_vm0, %v2550_v35  ;;  %1865 = vmatmul.msk.f32.gmra.mxu0 %vm388_vm0, %v2547_v34 }
  0x98   : > { %v502_v56 = vpop.f32.mrf.mxu0 }
  0x99   : > { %v503_v3 = vadd.f32 %v2544_v25, %v502_v56 }
  0x9b   : > { %v726_v62 = vmul.f32 %v503_v3, %v503_v3  ;;  %v598_v15 = vmul.f32 %v503_v3, %v2241_v9 }
  0x9d   : > { %v758_v13 = vsel %vm388_vm0, %v726_v62, 0.0  ;;  %v630_v52 = vsel %vm388_vm0, %v598_v15, 0.0 }
  0x9e   : > { %v550_v11 = vpop.f32.mrf.mxu2  ;;  %759 = vadd.xlane.f32.xlu2 %v758_v13  ;;  %631 = vadd.xlane.f32.xlu0 %v630_v52 }
  0x9f   : > { %v551_v10 = vadd.f32 %v2544_v25, %v550_v11 }
  0xa0   : > { %v505_v49 = vpop.f32.mrf.mxu0 }
  0xa1   : > { %v614_v35 = vmul.f32 %v551_v10, %v2368_v61  ;;  %v742_v51 = vmul.f32 %v551_v10, %v551_v10  ;;  %v506_v56 = vadd.f32 %v2544_v25, %v505_v49 }
  0xa3   : > { %v678_v34 = vsel %vm388_vm0, %v614_v35, 0.0  ;;  %v806_v55 = vsel %vm388_vm0, %v742_v51, 0.0  ;;  %v599_v13 = vmul.f32 %v506_v56, %v2238_v8 }
  0xa4   : > { %679 = vadd.xlane.f32.xlu1 %v678_v34 }
  0xa5   : > { %v633_v49 = vsel %vm388_vm0, %v599_v13, 0.0  ;;  %v2579_v13 = vpop.xlane.xlu1 %887 }
  0xa6   : > { %v553_v9 = vpop.f32.mrf.mxu2  ;;  %807 = vadd.xlane.f32.xlu0 %v806_v55  ;;  %v2573_v55 = vpop.xlane.xlu2 %890 }
  0xa7   : > { %v554_v62 = vadd.f32 %v2544_v25, %v553_v9 }
  0xa8   : > { %v508_v52 = vpop.f32.mrf.mxu0 }
  0xa9   : > { %v743_v15 = vmul.f32 %v554_v62, %v554_v62  ;;  %v615_v11 = vmul.f32 %v554_v62, %v2374_v63  ;;  %v509_v61 = vadd.f32 %v2544_v25, %v508_v52  ;;  %v727_v52 = vmul.f32 %v506_v56, %v506_v56 }
  0xab   : > { %v809_v10 = vsel %vm388_vm0, %v743_v15, 0.0  ;;  %v681_v35 = vsel %vm388_vm0, %v615_v11, 0.0  ;;  %v600_v51 = vmul.f32 %v509_v61, %v2248_v12  ;;  %v761_v12 = vsel %vm388_vm0, %v727_v52, 0.0 }
  0xac   : > { %810 = vadd.xlane.f32.xlu1 %v809_v10  ;;  %682 = vadd.xlane.f32.xlu2 %v681_v35  ;;  %v1565_v35 = vld [vmem:[%s3510_s4 + $0x18] sm:$0xff]  ;;  %v728_v56 = vmul.f32 %v509_v61, %v509_v61  ;;  %v1563_v61 = vld [vmem:[%s3510_s4 + $0x8] sm:$0xff] }
  0xad   : > { %v636_v63 = vsel %vm388_vm0, %v600_v51, 0.0  ;;  %v2588_v51 = vpop.xlane.xlu0 %893  ;;  %1924 = vmatpush.msra.mxu3 %v1565_v35  ;;  %1582 = vmatpush.msra.mxu1 %v1565_v35 }
  0xae   : > { %v556_v34 = vpop.f32.mrf.mxu2  ;;  %634 = vadd.xlane.f32.xlu0 %v633_v49  ;;  %v1564_v49 = vld [vmem:[%s3510_s4 + $0x10] sm:$0xff] }
  0xaf   : > { %v557_v8 = vadd.f32 %v2544_v25, %v556_v34  ;;  %v2590_v34 = vpop.xlane.xlu2 %899  ;;  %1925 = vmatpush.msra.mxu3 %v1564_v49  ;;  %1583 = vmatpush.msra.mxu1 %v1564_v49 }
  0xb0   : > { %v511_v3 = vpop.f32.mrf.mxu0  ;;  %3538 = vst [vmem:[#allocation16_spill] sm:$0xff] %v2590_v34  ;;  %v2602_v34 = vpop.xlane.xlu1 %896 }
  0xb1   : > { %v744_v9 = vmul.f32 %v557_v8, %v557_v8  ;;  %v512_v62 = vadd.f32 %v2544_v25, %v511_v3  ;;  %v616_v52 = vmul.f32 %v557_v8, %v2399_v17  ;;  %1926 = vmatpush.msra.mxu3 %v1563_v61  ;;  %1584 = vmatpush.msra.mxu1 %v1563_v61  ;;  %v1562_v8 = vld [vmem:[%s3510_s4] sm:$0xff] }
  0xb3   : > { %v812_v15 = vsel %vm388_vm0, %v744_v9, 0.0  ;;  %v729_v11 = vmul.f32 %v512_v62, %v512_v62  ;;  %v684_v35 = vsel %vm388_vm0, %v616_v52, 0.0  ;;  %1927 = vmatpush.msra.mxu3 %v1562_v8  ;;  %1585 = vmatpush.msra.mxu1 %v1562_v8 }
  0xb4   : > { %637 = vadd.xlane.f32.xlu1 %v636_v63  ;;  %813 = vadd.xlane.f32.xlu2 %v812_v15  ;;  %v764_v15 = vsel %vm388_vm0, %v728_v56, 0.0 }
  0xb5   : > { %v767_v63 = vsel %vm388_vm0, %v729_v11, 0.0  ;;  %1898 = vmatmul.msk.f32.vlgmr.msra.gmra.mxu3 %vm388_vm0, %v2215_v5  ;;  %1882 = vmatmul.msk.f32.vlgmr.msra.gmra.mxu1 %vm388_vm0, %v2212_v4 }
  0xb6   : > { %762 = vadd.xlane.f32.xlu0 %v761_v12  ;;  %v559_v10 = vpop.f32.mrf.mxu2 }
  0xb7   : > { %v560_v12 = vadd.f32 %v2544_v25, %v559_v10  ;;  %v601_v10 = vmul.f32 %v512_v62, %v2271_v21 }
  0xb8   : > { %v514_v3 = vpop.f32.mrf.mxu0 }
  0xb9   : > { %v515_v9 = vadd.f32 %v2544_v25, %v514_v3  ;;  %v745_v49 = vmul.f32 %v560_v12, %v560_v12  ;;  %v2614_v3 = vpop.xlane.xlu0 %902  ;;  %v639_v52 = vsel %vm388_vm0, %v601_v10, 0.0  ;;  %v617_v4 = vmul.f32 %v560_v12, %v2396_v16 }
  0xbb   : > { %v602_v11 = vmul.f32 %v515_v9, %v2253_v14  ;;  %v815_v21 = vsel %vm388_vm0, %v745_v49, 0.0 }
  0xbc   : > { %765 = vadd.xlane.f32.xlu1 %v764_v15  ;;  %768 = vadd.xlane.f32.xlu2 %v767_v63  ;;  %v2616_v63 = vpop.xlane.xlu2 %908  ;;  %v2622_v15 = vpop.xlane.xlu1 %905 }
  0xbd   : > { %v642_v14 = vsel %vm388_vm0, %v602_v11, 0.0  ;;  %1899 = vmatmul.msk.f32.gmra.mxu3 %vm388_vm0, %v2222_v6  ;;  %1883 = vmatmul.msk.f32.gmra.mxu1 %vm388_vm0, %v2225_v7 }
  0xbe   : > { %685 = vadd.xlane.f32.xlu0 %v684_v35  ;;  %v562_v17 = vpop.f32.mrf.mxu2 }
  0xbf   : > { %v563_v56 = vadd.f32 %v2544_v25, %v562_v17  ;;  %v730_v17 = vmul.f32 %v515_v9, %v515_v9 }
  0xc0   : > { %v517_v5 = vpop.f32.mrf.mxu0 }
  0xc1   : > { %v618_v62 = vmul.f32 %v563_v56, %v2402_v20  ;;  %v518_v11 = vadd.f32 %v2544_v25, %v517_v5  ;;  %v687_v20 = vsel %vm388_vm0, %v617_v4, 0.0  ;;  %v2632_v10 = vpop.xlane.xlu0 %911  ;;  %v770_v6 = vsel %vm388_vm0, %v730_v17, 0.0 }
  0xc2   : > { %v746_v7 = vmul.f32 %v563_v56, %v563_v56 }
  0xc3   : > { %v690_v35 = vsel %vm388_vm0, %v618_v62, 0.0  ;;  %v603_v12 = vmul.f32 %v518_v11, %v2274_v22 }
  0xc4   : > { %640 = vadd.xlane.f32.xlu1 %v639_v52  ;;  %643 = vadd.xlane.f32.xlu2 %v642_v14  ;;  %v2634_v16 = vpop.xlane.xlu2 %917  ;;  %v2644_v52 = vpop.xlane.xlu1 %914 }
  0xc5   : > { %1900 = vmatmul.msk.f32.gmra.mxu3 %vm388_vm0, %v2259_v18  ;;  %1884 = vmatmul.msk.f32.gmra.mxu1 %vm388_vm0, %v2262_v19  ;;  %v645_v9 = vsel %vm388_vm0, %v603_v12, 0.0  ;;  %v731_v18 = vmul.f32 %v518_v11, %v518_v11 }
  0xc6   : > { %816 = vadd.xlane.f32.xlu0 %v815_v21  ;;  %v565_v61 = vpop.f32.mrf.mxu2  ;;  %v818_v21 = vsel %vm388_vm0, %v746_v7, 0.0 }
  0xc7   : > { %v566_v8 = vadd.f32 %v2544_v25, %v565_v61 }
  0xc8   : > { %v520_v14 = vpop.f32.mrf.mxu0 }
  0xc9   : > { %v619_v49 = vmul.f32 %v566_v8, %v2427_v39  ;;  %v521_v22 = vadd.f32 %v2544_v25, %v520_v14  ;;  %v2649_v56 = vpop.xlane.xlu0 %920  ;;  %v747_v19 = vmul.f32 %v566_v8, %v566_v8 }
  0xcb   : > { %v693_v62 = vsel %vm388_vm0, %v619_v49, 0.0  ;;  %v604_v4 = vmul.f32 %v521_v22, %v2299_v32  ;;  %v821_v17 = vsel %vm388_vm0, %v747_v19, 0.0  ;;  %v732_v8 = vmul.f32 %v521_v22, %v521_v22 }
  0xcc   : > { %688 = vadd.xlane.f32.xlu1 %v687_v20  ;;  %691 = vadd.xlane.f32.xlu2 %v690_v35  ;;  %v2651_v5 = vpop.xlane.xlu2 %926  ;;  %v773_v35 = vsel %vm388_vm0, %v731_v18, 0.0 }
  0xcd   : > { %1901 = vmatmul.msk.f32.gmra.mxu3 %vm388_vm0, %v2290_v30  ;;  %1885 = vmatmul.msk.f32.gmra.mxu1 %vm388_vm0, %v2287_v29  ;;  %v648_v20 = vsel %vm388_vm0, %v604_v4, 0.0 }
  0xce   : > { %771 = vadd.xlane.f32.xlu0 %v770_v6  ;;  %v568_v39 = vpop.f32.mrf.mxu2  ;;  %v2662_v6 = vpop.xlane.xlu1 %923 }
  0xcf   : > { %v569_v61 = vadd.f32 %v2544_v25, %v568_v39 }
  0xd0   : > { %v523_v11 = vpop.f32.mrf.mxu0 }
  0xd1   : > { %v620_v32 = vmul.f32 %v569_v61, %v2424_v36  ;;  %v748_v12 = vmul.f32 %v569_v61, %v569_v61  ;;  %v2665_v29 = vpop.xlane.xlu0 %929  ;;  %v524_v14 = vadd.f32 %v2544_v25, %v523_v11 }
  0xd3   : > { %v696_v49 = vsel %vm388_vm0, %v620_v32, 0.0  ;;  %v733_v39 = vmul.f32 %v524_v14, %v524_v14 }
  0xd4   : > { %819 = vadd.xlane.f32.xlu1 %v818_v21  ;;  %646 = vadd.xlane.f32.xlu2 %v645_v9  ;;  %v2667_v7 = vpop.xlane.xlu2 %935  ;;  %v776_v9 = vsel %vm388_vm0, %v732_v8, 0.0  ;;  %v824_v21 = vsel %vm388_vm0, %v748_v12, 0.0 }
  0xd5   : > { %1902 = vmatmul.msk.f32.gmra.mxu3 %vm388_vm0, %v2321_v42  ;;  %1886 = vmatmul.msk.f32.gmra.mxu1 %vm388_vm0, %v2318_v41 }
  0xd6   : > { %694 = vadd.xlane.f32.xlu0 %v693_v62  ;;  %v571_v30 = vpop.f32.mrf.mxu2  ;;  %v605_v62 = vmul.f32 %v524_v14, %v2282_v26  ;;  %v2680_v42 = vpop.xlane.xlu1 %932 }
  0xd7   : > { %v572_v36 = vadd.f32 %v2544_v25, %v571_v30 }
  0xd8   : > { %v526_v41 = vpop.f32.mrf.mxu0  ;;  %v651_v19 = vsel %vm388_vm0, %v605_v62, 0.0 }
  0xd9   : > { %v621_v22 = vmul.f32 %v572_v36, %v2430_v40  ;;  %v527_v26 = vadd.f32 %v2544_v25, %v526_v41  ;;  %v2689_v61 = vpop.xlane.xlu0 %938 }
  0xdb   : > { %v699_v4 = vsel %vm388_vm0, %v621_v22, 0.0 }
  0xdc   : > { %774 = vadd.xlane.f32.xlu1 %v773_v35  ;;  %822 = vadd.xlane.f32.xlu2 %v821_v17  ;;  %v2691_v40 = vpop.xlane.xlu2 %944  ;;  %v779_v35 = vsel %vm388_vm0, %v733_v39, 0.0 }
  0xdd   : > { %1903 = vmatmul.msk.f32.gmra.mxu3 %vm388_vm0, %v2349_v53  ;;  %1887 = vmatmul.msk.f32.gmra.mxu1 %vm388_vm0, %v2352_v54  ;;  %v606_v53 = vmul.f32 %v527_v26, %v2302_v33  ;;  %v749_v54 = vmul.f32 %v572_v36, %v572_v36 }
  0xde   : > { %649 = vadd.xlane.f32.xlu0 %v648_v20  ;;  %v574_v18 = vpop.f32.mrf.mxu2  ;;  %v2697_v11 = vpop.xlane.xlu1 %941 }
  0xdf   : > { %v575_v17 = vadd.f32 %v2544_v25, %v574_v18  ;;  %v654_v30 = vsel %vm388_vm0, %v606_v53, 0.0  ;;  %v827_v8 = vsel %vm388_vm0, %v749_v54, 0.0 }
  0xe0   : > { %v529_v32 = vpop.f32.mrf.mxu0 }
  0xe1   : > { %v622_v20 = vmul.f32 %v575_v17, %v2455_v58  ;;  %v530_v33 = vadd.f32 %v2544_v25, %v529_v32  ;;  %v750_v36 = vmul.f32 %v575_v17, %v575_v17 }
  0xe3   : > { %v702_v12 = vsel %vm388_vm0, %v622_v20, 0.0  ;;  %v830_v22 = vsel %vm388_vm0, %v750_v36, 0.0 }
  0xe4   : > { %697 = vadd.xlane.f32.xlu1 %v696_v49  ;;  %777 = vadd.xlane.f32.xlu2 %v776_v9  ;;  %v2707_v49 = vpop.xlane.xlu0 %947  ;;  %v2709_v58 = vpop.xlane.xlu2 %953 }
  0xe5   : > { %1904 = vmatmul.msk.f32.gmra.mxu3 %vm388_vm0, %v2380_v1  ;;  %1888 = vmatmul.msk.f32.gmra.mxu1 %vm388_vm0, %v2377_v0  ;;  %v734_v1 = vmul.f32 %v527_v26, %v527_v26  ;;  %v607_v0 = vmul.f32 %v530_v33, %v2313_v38 }
  0xe6   : > { %825 = vadd.xlane.f32.xlu0 %v824_v21  ;;  %v577_v14 = vpop.f32.mrf.mxu2  ;;  %v2717_v21 = vpop.xlane.xlu1 %950 }
  0xe7   : > { %v578_v9 = vadd.f32 %v2544_v25, %v577_v14  ;;  %v782_v62 = vsel %vm388_vm0, %v734_v1, 0.0  ;;  %v657_v41 = vsel %vm388_vm0, %v607_v0, 0.0 }
  0xe8   : > { %v532_v39 = vpop.f32.mrf.mxu0 }
  0xec   : > { %652 = vadd.xlane.f32.xlu1 %v651_v19  ;;  %700 = vadd.xlane.f32.xlu2 %v699_v4  ;;  %v2722_v38 = vpop.xlane.xlu0 %956  ;;  %v2724_v18 = vpop.xlane.xlu2 %962  ;;  %v735_v19 = vmul.f32 %v530_v33, %v530_v33  ;;  %v751_v4 = vmul.f32 %v578_v9, %v578_v9 }
  0xed   : > { %1905 = vmatmul.msk.f32.gmra.mxu3 %vm388_vm0, %v2405_v23  ;;  %1889 = vmatmul.msk.f32.gmra.mxu1 %vm388_vm0, %v2408_v24  ;;  %v623_v23 = vmul.f32 %v578_v9, %v2452_v57 }
  0xee   : > { %780 = vadd.xlane.f32.xlu0 %v779_v35  ;;  %v580_v24 = vpop.f32.mrf.mxu2  ;;  %v533_v35 = vadd.f32 %v2544_v25, %v532_v39  ;;  %v785_v53 = vsel %vm388_vm0, %v735_v19, 0.0  ;;  %v833_v57 = vsel %vm388_vm0, %v751_v4, 0.0  ;;  %v2736_v54 = vpop.xlane.xlu1 %959 }
  0xef   : > { %v705_v26 = vsel %vm388_vm0, %v623_v23, 0.0  ;;  %v581_v17 = vadd.f32 %v2544_v25, %v580_v24 }
  0xf0   : > { %v608_v20 = vmul.f32 %v533_v35, %v2310_v37 }
  0xf2   : > { %v660_v33 = vsel %vm388_vm0, %v608_v20, 0.0 }
  0xf4   : > { %828 = vadd.xlane.f32.xlu1 %v827_v8  ;;  %655 = vadd.xlane.f32.xlu2 %v654_v30  ;;  %v2740_v32 = vpop.xlane.xlu0 %965  ;;  %v2742_v30 = vpop.xlane.xlu2 %971  ;;  %v736_v8 = vmul.f32 %v533_v35, %v533_v35 }
  0xf5   : > { %1906 = vmatmul.msk.f32.gmra.mxu3 %vm388_vm0, %v2433_v43  ;;  %1890 = vmatmul.msk.f32.gmra.mxu1 %vm388_vm0, %v2436_v44  ;;  %v624_v43 = vmul.f32 %v581_v17, %v2458_v59  ;;  %v535_v44 = vpop.f32.mrf.mxu0 }
  0xf6   : > { %703 = vadd.xlane.f32.xlu0 %v702_v12  ;;  %v583_v12 = vpop.f32.mrf.mxu2  ;;  %v536_v59 = vadd.f32 %v2544_v25, %v535_v44  ;;  %v788_v14 = vsel %vm388_vm0, %v736_v8, 0.0  ;;  %v2753_v36 = vpop.xlane.xlu1 %968 }
  0xf7   : > { %v708_v37 = vsel %vm388_vm0, %v624_v43, 0.0  ;;  %v584_v1 = vadd.f32 %v2544_v25, %v583_v12  ;;  %v1462_v12 = vlaneseq }
  0xf8   : > { %v609_v0 = vmul.f32 %v536_v59, %v2332_v45 }
  0xf9   : > { %v753_v4 = vmul.f32 %v584_v1, %v584_v1 }
  0xfb   : > { %v839_v20 = vsel %vm388_vm0, %v753_v4, 0.0  ;;  %v3541_v4 = vld [vmem:[#allocation5_spill] sm:$0xff] }
  0xfc   : > { %783 = vadd.xlane.f32.xlu1 %v782_v62  ;;  %831 = vadd.xlane.f32.xlu2 %v830_v22 }
  0xfd   : > { %1907 = vmatmul.msk.f32.gmra.mxu3 %vm388_vm0, %v2464_v2  ;;  %1891 = vmatmul.msk.f32.gmra.mxu1 %vm388_vm0, %v2461_v60  ;;  %v752_v2 = vmul.f32 %v581_v17, %v581_v17  ;;  %v625_v60 = vmul.f32 %v584_v1, %v2506_v48  ;;  %v538_v9 = vpop.f32.mrf.mxu0 }
  0xfe   : > { %658 = vadd.xlane.f32.xlu0 %v657_v41  ;;  %v663_v41 = vsel %vm388_vm0, %v609_v0, 0.0  ;;  %v539_v48 = vadd.f32 %v2544_v25, %v538_v9  ;;  %v586_v24 = vpop.f32.mrf.mxu2 }
  0xff   : > { %v836_v45 = vsel %vm388_vm0, %v752_v2, 0.0  ;;  %v711_v23 = vsel %vm388_vm0, %v625_v60, 0.0  ;;  %v587_v35 = vadd.f32 %v2544_v25, %v586_v24  ;;  %v3540_v60 = vld [vmem:[#allocation8_spill] sm:$0xff] }
 0x104   : > { %706 = vadd.xlane.f32.xlu1 %v705_v26  ;;  %786 = vadd.xlane.f32.xlu2 %v785_v53  ;;  %v610_v26 = vmul.f32 %v539_v48, %v2342_v50 }
 0x105   : > { %1908 = vmatmul.msk.f32.gmra.mxu3 %vm388_vm0, %v2483_v28  ;;  %1892 = vmatmul.msk.f32.gmra.mxu1 %vm388_vm0, %v2486_v31  ;;  %v737_v31 = vmul.f32 %v536_v59, %v536_v59  ;;  %v541_v53 = vpop.f32.mrf.mxu0  ;;  %v738_v59 = vmul.f32 %v539_v48, %v539_v48 }
 0x106   : > { %834 = vadd.xlane.f32.xlu0 %v833_v57  ;;  %v666_v43 = vsel %vm388_vm0, %v610_v26, 0.0  ;;  %v589_v8 = vpop.f32.mrf.mxu2  ;;  %v542_v0 = vadd.f32 %v2544_v25, %v541_v53 }
 0x107   : > { %v791_v57 = vsel %vm388_vm0, %v737_v31, 0.0  ;;  %v590_v2 = vadd.f32 %v2544_v25, %v589_v8  ;;  %v794_v48 = vsel %vm388_vm0, %v738_v59, 0.0  ;;  %v3542_v59 = vld [vmem:[#allocation10_spill] sm:$0xff] }
 0x108   : > { %v611_v26 = vmul.f32 %v542_v0, %v3541_v4 }
 0x10c   : > { %661 = vadd.xlane.f32.xlu1 %v660_v33  ;;  %709 = vadd.xlane.f32.xlu2 %v708_v37 }
 0x10d   : > { %1909 = vmatmul.msk.f32.gmra.mxu3 %vm388_vm0, %v2496_v46  ;;  %1893 = vmatmul.msk.f32.gmra.mxu1 %vm388_vm0, %v2499_v47  ;;  %v626_v47 = vmul.f32 %v587_v35, %v2480_v27  ;;  %v3539_v27 = vld [vmem:[#allocation9_spill] sm:$0xff] }
 0x10e   : > { %789 = vadd.xlane.f32.xlu0 %v788_v14  ;;  %v754_v14 = vmul.f32 %v587_v35, %v587_v35  ;;  %v544_v35 = vpop.f32.mrf.mxu0 }
 0x110   : > { %v842_v24 = vsel %vm388_vm0, %v754_v14, 0.0  ;;  %v3543_v14 = vld [vmem:[#allocation11_spill] sm:$0xff] }
 0x111   : > { %v760_v62 = vpop.xlane.xlu2 %759  ;;  %v2761_v22 = vpop.xlane.xlu0 %631 }
 0x112   : > { %v982_v39 = vmul.f32 %v2579_v13, %v760_v62 }
 0x114   : > { %v1014_v19 = vmax.f32 %v982_v39, 1e-16  ;;  %837 = vadd.xlane.f32.xlu1 %v836_v45  ;;  %664 = vadd.xlane.f32.xlu2 %v663_v41  ;;  %v714_v41 = vsel %vm388_vm0, %v626_v47, 0.0  ;;  %v2797_v39 = vld [vmem:[%s2231_s14 + $0xe8] sm:$0xff]  ;;  %v2799_v45 = vand.u32 127, %v1462_v12 }
 0x115   : > { %1910 = vmatmul.msk.f32.gmra.mxu3 %vm388_vm0, %v3539_v27  ;;  %1894 = vmatmul.msk.f32.gmra.mxu1 %vm388_vm0, %v3540_v60 }
 0x116   : > { %1971 = vrsqrt.f32 %v1014_v19  ;;  %712 = vadd.xlane.f32.xlu0 %v711_v23  ;;  %vm1052_vm2 = vweird.f32 %v1014_v19  ;;  %vm1465_vm4 = vcmp.eq.s32.totalorder %v2799_v45, 1  ;;  %vm1464_vm5 = vcmp.eq.s32.totalorder %v2799_v45, 0 }
 0x117   : > { %v2768_v28 = vpop.xlane.xlu1 %679 }
 0x119   : > { %v808_v13 = vpop.xlane.xlu0 %807 }
 0x11a   : > { %v998_v17 = vmul.f32 %v2667_v7, %v808_v13  ;;  %v627_v13 = vmul.f32 %v590_v2, %v2797_v39 }
 0x11c   : > { %v1972_v44 = vpop.eup %1971  ;;  %v2780_v50 = vmax.f32 %v998_v17, 1e-16  ;;  %792 = vadd.xlane.f32.xlu1 %v791_v57  ;;  %840 = vadd.xlane.f32.xlu2 %v839_v20  ;;  %v739_v57 = vmul.f32 %v542_v0, %v542_v0  ;;  %v592_v20 = vpop.f32.mrf.mxu2  ;;  %v717_v27 = vsel %vm388_vm0, %v627_v13, 0.0 }
 0x11d   : > { %v1047_v46 = vmul.f32 %v1972_v44, %v1014_v19  ;;  %vm1053_vm1 = vweird.f32 %v1972_v44  ;;  %1911 = vmatmul.msk.f32.gmra.mxu3 %vm388_vm0, %v3542_v59  ;;  %1895 = vmatmul.msk.f32.gmra.mxu1 %vm388_vm0, %v3543_v14 }
 0x11e   : > { %1973 = vrsqrt.f32 %v2780_v50  ;;  %667 = vadd.xlane.f32.xlu0 %v666_v43  ;;  %vm1054_vm3 = vmor %vm1052_vm2, %vm1053_vm1  ;;  %v797_v60 = vsel %vm388_vm0, %v739_v57, 0.0  ;;  %vm1212_vm7 = vweird.f32 %v2780_v50 }
 0x11f   : > { %v1048_v7 = vmul.f32 %v1972_v44, %v1047_v46  ;;  %v811_v33 = vpop.xlane.xlu1 %810  ;;  %v2784_v37 = vpop.xlane.xlu2 %682  ;;  %v1430_v46 = vmul.f32 0.17677669, %v2761_v22 }
 0x120   : > { %v999_v1 = vmul.f32 %v2689_v61, %v811_v33  ;;  %v669_v33 = vsel %vm388_vm0, %v611_v26, 0.0 }
 0x121   : > { %v1049_v9 = vmul.f32 0.5, %v1048_v7  ;;  %v2793_v62 = vpop.xlane.xlu0 %634 }
 0x122   : > { %v2801_v61 = vmax.f32 %v999_v1, 1e-16 }
 0x123   : > { %v1050_v23 = vsub.f32 1.5, %v1049_v9 }
 0x124   : > { %v2805_v31 = vpop.eup %1973  ;;  %1975 = vrsqrt.f32 %v2801_v61  ;;  %715 = vadd.xlane.f32.xlu1 %v714_v41  ;;  %795 = vadd.xlane.f32.xlu2 %v794_v48  ;;  %v593_v48 = vadd.f32 %v2544_v25, %v592_v20  ;;  %vm1222_vm10 = vweird.f32 %v2801_v61 }
 0x125   : > { %v1051_v17 = vmul.f32 %v1972_v44, %v1050_v23  ;;  %v1207_v53 = vmul.f32 %v2805_v31, %v2780_v50  ;;  %vm1213_vm6 = vweird.f32 %v2805_v31 }
 0x126   : > { %843 = vadd.xlane.f32.xlu0 %v842_v24  ;;  %v1466_v24 = vsel %vm1465_vm4, %v1430_v46, 0.0  ;;  %vm1214_vm8 = vmor %vm1212_vm7, %vm1213_vm6 }
 0x127   : > { %v1055_v43 = vsel %vm1054_vm3, %v1972_v44, %v1051_v17  ;;  %v1208_v19 = vmul.f32 %v2805_v31, %v1207_v53  ;;  %v2822_v47 = vpop.xlane.xlu1 %637  ;;  %v814_v8 = vpop.xlane.xlu2 %813  ;;  %v545_v44 = vadd.f32 %v2544_v25, %v544_v35 }
 0x128   : > { %v1366_v12 = vmul.f32 %v1055_v43, %v2761_v22  ;;  %v1000_v7 = vmul.f32 %v2697_v11, %v814_v8  ;;  %v755_v22 = vmul.f32 %v590_v2, %v590_v2  ;;  %v2846_v2 = vld [vmem:[%s2231_s14 + $0xf0] sm:$0xff]  ;;  %v547_v53 = vpop.f32.mrf.mxu0 }
 0x129   : > { %v1209_v1 = vmul.f32 0.5, %v1208_v19  ;;  %v763_v0 = vpop.xlane.xlu0 %762  ;;  %v628_v46 = vmul.f32 %v593_v48, %v2846_v2  ;;  %v1446_v19 = vmul.f32 0.17677669, %v2768_v28  ;;  %v548_v50 = vadd.f32 %v2544_v25, %v547_v53 }
 0x12a   : > { %v2834_v9 = vpop.eup %1975  ;;  %v1398_v11 = vmul.f32 10.0, %v1366_v12  ;;  %v2836_v41 = vmax.f32 %v1000_v7, 1e-16  ;;  %v983_v23 = vmul.f32 %v2573_v55, %v763_v0  ;;  %v3544_v55 = vld [vmem:[#allocation6_spill] sm:$0xff]  ;;  %v845_v43 = vsel %vm388_vm0, %v755_v22, 0.0 }
 0x12b   : > { %v1210_v4 = vsub.f32 1.5, %v1209_v1  ;;  %v1217_v26 = vmul.f32 %v2834_v9, %v2801_v61  ;;  %v612_v17 = vmul.f32 %v545_v44, %v3544_v55  ;;  %vm1223_vm9 = vweird.f32 %v2834_v9 }
 0x12c   : > { %v1498_v13 = vsel %vm1464_vm5, %v1398_v11, %v1466_v24  ;;  %1977 = vrsqrt.f32 %v2836_v41  ;;  %v2851_v35 = vmax.f32 %v983_v23, 1e-16  ;;  %670 = vadd.xlane.f32.xlu1 %v669_v33  ;;  %718 = vadd.xlane.f32.xlu2 %v717_v27  ;;  %v3545_v27 = vld [vmem:[#allocation12_spill] sm:$0xff]  ;;  %v740_v11 = vmul.f32 %v545_v44, %v545_v44  ;;  %vm1224_vm11 = vmor %vm1222_vm10, %vm1223_vm9 }
 0x12d   : > { %1530 = vst [vmem:[%s2855_s15] sm:$0xff] %v1498_v13  ;;  %v1211_v57 = vmul.f32 %v2805_v31, %v1210_v4  ;;  %v1218_v20 = vmul.f32 %v2834_v9, %v1217_v26  ;;  %v672_v0 = vsel %vm388_vm0, %v612_v17, 0.0  ;;  %1912 = vmatmul.msk.f32.gmra.mxu3 %vm388_vm0, %v3545_v27  ;;  %v756_v23 = vmul.f32 %v593_v48, %v593_v48  ;;  %v3547_v17 = vld [vmem:[#allocation7_spill] sm:$0xff] }
 0x12e   : > { %1979 = vrsqrt.f32 %v2851_v35  ;;  %798 = vadd.xlane.f32.xlu0 %v797_v60  ;;  %v3546_v60 = vld [vmem:[#allocation13_spill] sm:$0xff]  ;;  %v720_v4 = vsel %vm388_vm0, %v628_v46, 0.0  ;;  %v1482_v26 = vsel %vm1465_vm4, %v1446_v19, 0.0  ;;  %v613_v53 = vmul.f32 %v548_v50, %v3547_v17  ;;  %v595_v19 = vpop.f32.mrf.mxu2  ;;  %v3548_v27 = vld [vmem:[#allocation15_spill] sm:$0xff] }
 0x12f   : > { %v1215_v8 = vsel %vm1214_vm8, %v2805_v31, %v1211_v57  ;;  %v1219_v12 = vmul.f32 0.5, %v1218_v20  ;;  %v766_v7 = vpop.xlane.xlu1 %765  ;;  %v769_v33 = vpop.xlane.xlu2 %768  ;;  %1896 = vmatmul.msk.f32.gmra.mxu1 %vm388_vm0, %v3546_v60  ;;  %v1447_v57 = vmul.f32 0.17677669, %v2784_v37  ;;  %v3549_v60 = vld [vmem:[#allocation14_spill] sm:$0xff]  ;;  %vm1232_vm13 = vweird.f32 %v2836_v41 }
 0x130   : > { %v1382_v59 = vmul.f32 %v1215_v8, %v2768_v28  ;;  %v984_v14 = vmul.f32 %v2588_v51, %v766_v7  ;;  %v985_v1 = vmul.f32 %v2602_v34, %v769_v33  ;;  %v800_v33 = vsel %vm388_vm0, %v740_v11, 0.0 }
 0x131   : > { %v1220_v31 = vsub.f32 1.5, %v1219_v12  ;;  %v2878_v22 = vpop.xlane.xlu0 %685  ;;  %vm1062_vm15 = vweird.f32 %v2851_v35 }
 0x132   : > { %v2880_v28 = vpop.eup %1977  ;;  %v1414_v51 = vmul.f32 10.0, %v1382_v59  ;;  %v2882_v34 = vmax.f32 %v984_v14, 1e-16  ;;  %v2884_v24 = vmax.f32 %v985_v1, 1e-16  ;;  %v848_v59 = vsel %vm388_vm0, %v756_v23, 0.0 }
 0x133   : > { %v1221_v13 = vmul.f32 %v2834_v9, %v1220_v31  ;;  %v1227_v44 = vmul.f32 %v2880_v28, %v2836_v41  ;;  %v596_v1 = vadd.f32 %v2544_v25, %v595_v19  ;;  %v1483_v31 = vsel %vm1465_vm4, %v1447_v57, 0.0 }
 0x134   : > { %v2893_v48 = vpop.eup %1979  ;;  %v1514_v55 = vsel %vm1464_vm5, %v1414_v51, %v1482_v26  ;;  %1981 = vrsqrt.f32 %v2882_v34  ;;  %846 = vadd.xlane.f32.xlu1 %v845_v43  ;;  %673 = vadd.xlane.f32.xlu2 %v672_v0  ;;  %v741_v0 = vmul.f32 %v548_v50, %v548_v50  ;;  %vm1233_vm12 = vweird.f32 %v2880_v28 }
 0x135   : > { %1546 = vst [vmem:[%s2855_s15 + $0x80] sm:$0xff] %v1514_v55  ;;  %v1225_v61 = vsel %vm1224_vm11, %v2834_v9, %v1221_v13  ;;  %v1228_v20 = vmul.f32 %v2880_v28, %v1227_v44  ;;  %v1057_v46 = vmul.f32 %v2893_v48, %v2851_v35  ;;  %1983 = vrsqrt.f32 %v2884_v24  ;;  %1913 = vmatmul.msk.f32.gmra.mxu3 %vm388_vm0, %v3548_v27  ;;  %vm1234_vm1 = vmor %vm1232_vm13, %vm1233_vm12 }
 0x136   : > { %v1383_v8 = vmul.f32 %v1225_v61, %v2784_v37  ;;  %721 = vadd.xlane.f32.xlu0 %v720_v4  ;;  %v675_v37 = vsel %vm388_vm0, %v613_v53, 0.0  ;;  %v379_v4 = vld [vmem:[%s2231_s14 + $0xf8] sm:$0xff]  ;;  %v1431_v26 = vmul.f32 0.17677669, %v2793_v62  ;;  %vm1063_vm14 = vweird.f32 %v2893_v48  ;;  %s1716_s14 = scalar_lea.sflag [#allocation3], %s287_s9 }
 0x137   : > { %v1229_v43 = vmul.f32 0.5, %v1228_v20  ;;  %v1058_v12 = vmul.f32 %v2893_v48, %v1057_v46  ;;  %v2910_v7 = vpop.xlane.xlu1 %640  ;;  %v2912_v9 = vpop.xlane.xlu2 %643  ;;  %1897 = vmatmul.msk.f32.gmra.mxu1 %vm388_vm0, %v3549_v60  ;;  %v1448_v41 = vmul.f32 0.17677669, %v2878_v22  ;;  %vm1064_vm2 = vmor %vm1062_vm15, %vm1063_vm14  ;;  %vm1072_vm6 = vweird.f32 %v2882_v34 }
 0x138   : > { %v1415_v14 = vmul.f32 10.0, %v1383_v8  ;;  %v757_v8 = vmul.f32 %v596_v1, %v596_v1  ;;  %v1467_v27 = vsel %vm1465_vm4, %v1431_v26, 0.0  ;;  %v3550_v26 = vld [vmem:[#allocation16_spill] sm:$0xff]  ;;  %vm1082_vm9 = vweird.f32 %v2884_v24 }
 0x139   : > { %v1230_v51 = vsub.f32 1.5, %v1229_v43  ;;  %v1059_v11 = vmul.f32 0.5, %v1058_v12  ;;  %v817_v23 = vpop.xlane.xlu0 %816 }
 0x13a   : > { %v2926_v25 = vpop.eup %1981  ;;  %v1515_v50 = vsel %vm1464_vm5, %v1415_v14, %v1483_v31  ;;  %v1001_v13 = vmul.f32 %v2691_v40, %v817_v23  ;;  %v629_v40 = vmul.f32 %v596_v1, %v379_v4  ;;  %v1484_v31 = vsel %vm1465_vm4, %v1448_v41, 0.0 }
 0x13b   : > { %1547 = vst [vmem:[%s2855_s15 + $0x88] sm:$0xff] %v1515_v50  ;;  %v1060_v44 = vsub.f32 1.5, %v1059_v11  ;;  %v1067_v55 = vmul.f32 %v2926_v25, %v2882_v34  ;;  %v1231_v17 = vmul.f32 %v2880_v28, %v1230_v51  ;;  %v2938_v53 = vpop.eup %1983  ;;  %vm1073_vm3 = vweird.f32 %v2926_v25 }
 0x13c   : > { %v2944_v61 = vmax.f32 %v1001_v13, 1e-16  ;;  %801 = vadd.xlane.f32.xlu1 %v800_v33  ;;  %849 = vadd.xlane.f32.xlu2 %v848_v59  ;;  %v1077_v46 = vmul.f32 %v2938_v53, %v2884_v24  ;;  %v723_v1 = vsel %vm388_vm0, %v629_v40, 0.0  ;;  %vm1083_vm7 = vweird.f32 %v2938_v53  ;;  %vm1074_vm8 = vmor %vm1072_vm6, %vm1073_vm3 }
 0x13d   : > { %v1061_v57 = vmul.f32 %v2893_v48, %v1060_v44  ;;  %v1068_v20 = vmul.f32 %v2926_v25, %v1067_v55  ;;  %v1235_v19 = vsel %vm1234_vm1, %v2880_v28, %v1231_v17  ;;  %v803_v28 = vsel %vm388_vm0, %v741_v0, 0.0  ;;  %vm3000_vm10 = vmor %vm1082_vm9, %vm1083_vm7 }
 0x13e   : > { %v1384_v35 = vmul.f32 %v1235_v19, %v2878_v22  ;;  %1985 = vrsqrt.f32 %v2944_v61  ;;  %676 = vadd.xlane.f32.xlu0 %v675_v37  ;;  %v1078_v33 = vmul.f32 %v2938_v53, %v1077_v46  ;;  %v1432_v55 = vmul.f32 0.17677669, %v2822_v47  ;;  %v2995_v46 = vld [vmem:[%s3511_s5] ss:$0 sm:$0xff] }
 0x13f   : > { %v1065_v43 = vsel %vm1064_vm2, %v2893_v48, %v1061_v57  ;;  %v1069_v12 = vmul.f32 0.5, %v1068_v20  ;;  %v2957_v59 = vpop.xlane.xlu1 %688  ;;  %v2959_v14 = vpop.xlane.xlu2 %691  ;;  %v884_v17 = vmul.f32 %v2846_v2, %v2846_v2  ;;  %v885_v41 = vmul.f32 %v379_v4, %v379_v4 }
 0x140   : > { %v1367_v22 = vmul.f32 %v1065_v43, %v2793_v62  ;;  %v1416_v60 = vmul.f32 10.0, %v1384_v35  ;;  %v1079_v48 = vmul.f32 0.5, %v1078_v33  ;;  %v851_v62 = vsel %vm388_vm0, %v757_v8, 0.0  ;;  %v1635_v35 = vpop.f32.mrf.mxu3 }
 0x141   : > { %v1070_v37 = vsub.f32 1.5, %v1069_v12  ;;  %v772_v51 = vpop.xlane.xlu0 %771  ;;  %v1433_v24 = vmul.f32 0.17677669, %v2910_v7  ;;  %vm1242_vm12 = vweird.f32 %v2944_v61 }
 0x142   : > { %v1399_v11 = vmul.f32 10.0, %v1367_v22  ;;  %v1516_v0 = vsel %vm1464_vm5, %v1416_v60, %v1484_v31  ;;  %v1080_v50 = vsub.f32 1.5, %v1079_v48  ;;  %v986_v13 = vmul.f32 %v3550_v26, %v772_v51 }
 0x143   : > { %v1071_v23 = vmul.f32 %v2926_v25, %v1070_v37  ;;  %1548 = vst [vmem:[%s2855_s15 + $0x90] sm:$0xff] %v1516_v0  ;;  %v976_v48 = vsel %vm388_vm0, %v884_v17, 0.0  ;;  %v979_v31 = vsel %vm388_vm0, %v885_v41, 0.0  ;;  %v1449_v17 = vmul.f32 0.17677669, %v2957_v59 }
 0x144   : > { %v2977_v44 = vpop.eup %1985  ;;  %v1499_v34 = vsel %vm1464_vm5, %v1399_v11, %v1467_v27  ;;  %724 = vadd.xlane.f32.xlu1 %v723_v1  ;;  %804 = vadd.xlane.f32.xlu2 %v803_v28  ;;  %v1081_v57 = vmul.f32 %v2938_v53, %v1080_v50  ;;  %v3005_v4 = vmax.f32 %v986_v13, 1e-16  ;;  %v1636_v28 = vadd.f32 %v2995_v46, %v1635_v35 }
 0x145   : > { %1531 = vst [vmem:[%s2855_s15 + $0x8] sm:$0xff] %v1499_v34  ;;  %v1075_v40 = vsel %vm1074_vm8, %v2926_v25, %v1071_v23  ;;  %v1237_v20 = vmul.f32 %v2977_v44, %v2944_v61  ;;  %v883_v25 = vmul.f32 %v2797_v39, %v2797_v39  ;;  %v1468_v27 = vsel %vm1465_vm4, %v1432_v55, 0.0 }
 0x146   : > { %v1368_v19 = vmul.f32 %v1075_v40, %v2822_v47  ;;  %852 = vadd.xlane.f32.xlu0 %v851_v62  ;;  %v1587_v47 = vpop.f32.mrf.mxu1  ;;  %v1085_v8 = vsel %vm3000_vm10, %v2938_v53, %v1081_v57  ;;  %1987 = vrsqrt.f32 %v3005_v4  ;;  %1699 = vst.msk [vmem:[%s3013_s19 + $0x80] sm:$0xff] %vm388_vm0, %v1636_v28  ;;  %vm1243_vm11 = vweird.f32 %v2977_v44 }
 0x147   : > { %v1238_v43 = vmul.f32 %v2977_v44, %v1237_v20  ;;  %v820_v12 = vpop.xlane.xlu1 %819  ;;  %v3019_v33 = vpop.xlane.xlu2 %646  ;;  %v1588_v39 = vadd.f32 %v2995_v46, %v1587_v47  ;;  %v1369_v60 = vmul.f32 %v1085_v8, %v2910_v7  ;;  %v973_v7 = vsel %vm388_vm0, %v883_v25, 0.0  ;;  %vm1244_vm13 = vmor %vm1242_vm12, %vm1243_vm11 }
 0x148   : > { %v1400_v22 = vmul.f32 10.0, %v1368_v19  ;;  %v1002_v1 = vmul.f32 %v2707_v49, %v820_v12  ;;  %v1469_v49 = vsel %vm1465_vm4, %v1433_v24, 0.0  ;;  %v1638_v55 = vpop.f32.mrf.mxu3  ;;  %vm1092_vm15 = vweird.f32 %v3005_v4 }
 0x149   : > { %v1239_v53 = vmul.f32 0.5, %v1238_v43  ;;  %v3028_v37 = vpop.xlane.xlu0 %694  ;;  %1683 = vst.msk [vmem:[%s3013_s19] sm:$0xff] %vm388_vm0, %v1588_v39  ;;  %v1401_v11 = vmul.f32 10.0, %v1369_v60  ;;  %v1639_v24 = vadd.f32 %v2995_v46, %v1638_v55 }
 0x14a   : > { %v1500_v51 = vsel %vm1464_vm5, %v1400_v22, %v1468_v27  ;;  %v3043_v62 = vmax.f32 %v1002_v1, 1e-16 }
 0x14b   : > { %1532 = vst [vmem:[%s2855_s15 + $0x10] sm:$0xff] %v1500_v51  ;;  %v1240_v0 = vsub.f32 1.5, %v1239_v53  ;;  %v1501_v23 = vsel %vm1464_vm5, %v1401_v11, %v1469_v49 }
 0x14c   : > { %977 = vadd.xlane.f32.xlu1 %v976_v48  ;;  %980 = vadd.xlane.f32.xlu2 %v979_v31  ;;  %1533 = vst [vmem:[%s2855_s15 + $0x18] sm:$0xff] %v1501_v23  ;;  %1989 = vrsqrt.f32 %v3043_v62  ;;  %v1988_v26 = vpop.eup %1987  ;;  %vm1252_vm3 = vweird.f32 %v3043_v62 }
 0x14d   : > { %v1241_v50 = vmul.f32 %v2977_v44, %v1240_v0  ;;  %v1087_v41 = vmul.f32 %v1988_v26, %v3005_v4  ;;  %1700 = vst.msk [vmem:[%s3013_s19 + $0x88] sm:$0xff] %vm388_vm0, %v1639_v24  ;;  %vm1093_vm14 = vweird.f32 %v1988_v26 }
 0x14e   : > { %974 = vadd.xlane.f32.xlu0 %v973_v7  ;;  %v1590_v13 = vpop.f32.mrf.mxu1  ;;  %vm1094_vm1 = vmor %vm1092_vm15, %vm1093_vm14  ;;  %v1434_v7 = vmul.f32 0.17677669, %v2912_v9 }
 0x14f   : > { %v1245_v34 = vsel %vm1244_vm13, %v2977_v44, %v1241_v50  ;;  %v775_v40 = vpop.xlane.xlu1 %774  ;;  %v823_v57 = vpop.xlane.xlu2 %822  ;;  %v1591_v61 = vadd.f32 %v2995_v46, %v1590_v13  ;;  %v1088_v25 = vmul.f32 %v1988_v26, %v1087_v41 }
 0x150   : > { %v1385_v20 = vmul.f32 %v1245_v34, %v2957_v59  ;;  %v987_v19 = vmul.f32 %v2614_v3, %v775_v40  ;;  %v1003_v2 = vmul.f32 %v2717_v21, %v823_v57  ;;  %v1485_v3 = vsel %vm1465_vm4, %v1449_v17, 0.0  ;;  %v1641_v22 = vpop.f32.mrf.mxu3 }
 0x151   : > { %v3059_v44 = vpop.xlane.xlu0 %649  ;;  %1684 = vst.msk [vmem:[%s3013_s19 + $0x8] sm:$0xff] %vm388_vm0, %v1591_v61  ;;  %v1089_v43 = vmul.f32 0.5, %v1088_v25  ;;  %v1642_v31 = vadd.f32 %v2995_v46, %v1641_v22  ;;  %v1450_v34 = vmul.f32 0.17677669, %v2959_v14  ;;  %v1470_v40 = vsel %vm1465_vm4, %v1434_v7, 0.0 }
 0x152   : > { %v1417_v47 = vmul.f32 10.0, %v1385_v20  ;;  %v3063_v35 = vmax.f32 %v987_v19, 1e-16  ;;  %v3065_v8 = vmax.f32 %v1003_v2, 1e-16  ;;  %v1990_v59 = vpop.eup %1989 }
 0x153   : > { %v1247_v12 = vmul.f32 %v1990_v59, %v3043_v62  ;;  %v1090_v39 = vsub.f32 1.5, %v1089_v43  ;;  %vm1253_vm2 = vweird.f32 %v1990_v59  ;;  %1701 = vst.msk [vmem:[%s3013_s19 + $0x90] sm:$0xff] %vm388_vm0, %v1642_v31  ;;  %v1486_v43 = vsel %vm1465_vm4, %v1450_v34, 0.0 }
 0x154   : > { %v1517_v21 = vsel %vm1464_vm5, %v1417_v47, %v1485_v3  ;;  %1991 = vrsqrt.f32 %v3063_v35  ;;  %vm1254_vm6 = vmor %vm1252_vm3, %vm1253_vm2  ;;  %v1451_v31 = vmul.f32 0.17677669, %v3028_v37  ;;  %vm1102_vm9 = vweird.f32 %v3063_v35 }
 0x155   : > { %1549 = vst [vmem:[%s2855_s15 + $0x98] sm:$0xff] %v1517_v21  ;;  %1993 = vrsqrt.f32 %v3065_v8  ;;  %v1248_v28 = vmul.f32 %v1990_v59, %v1247_v12  ;;  %v1091_v60 = vmul.f32 %v1988_v26, %v1090_v39  ;;  %vm1262_vm11 = vweird.f32 %v3065_v8 }
 0x156   : > { %v1593_v27 = vpop.f32.mrf.mxu1 }
 0x157   : > { %v3078_v53 = vpop.xlane.xlu1 %697  ;;  %v778_v1 = vpop.xlane.xlu2 %777  ;;  %v1594_v48 = vadd.f32 %v2995_v46, %v1593_v27  ;;  %v1249_v51 = vmul.f32 0.5, %v1248_v28  ;;  %v1095_v49 = vsel %vm1094_vm1, %v1988_v26, %v1091_v60  ;;  %v1435_v27 = vmul.f32 0.17677669, %v3019_v33 }
 0x158   : > { %v988_v11 = vmul.f32 %v2622_v15, %v778_v1  ;;  %v1370_v4 = vmul.f32 %v1095_v49, %v2912_v9  ;;  %v1644_v24 = vpop.f32.mrf.mxu3 }
 0x159   : > { %v826_v0 = vpop.xlane.xlu0 %825  ;;  %1685 = vst.msk [vmem:[%s3013_s19 + $0x10] sm:$0xff] %vm388_vm0, %v1594_v48  ;;  %v1250_v50 = vsub.f32 1.5, %v1249_v51  ;;  %v1645_v28 = vadd.f32 %v2995_v46, %v1644_v24 }
 0x15a   : > { %v1992_v23 = vpop.eup %1991  ;;  %v3087_v13 = vmax.f32 %v988_v11, 1e-16  ;;  %v1004_v26 = vmul.f32 %v2709_v58, %v826_v0  ;;  %v1402_v17 = vmul.f32 10.0, %v1370_v4 }
 0x15b   : > { %v1994_v55 = vpop.eup %1993  ;;  %v1097_v15 = vmul.f32 %v1992_v23, %v3063_v35  ;;  %v1251_v41 = vmul.f32 %v1990_v59, %v1250_v50  ;;  %vm1103_vm7 = vweird.f32 %v1992_v23  ;;  %1702 = vst.msk [vmem:[%s3013_s19 + $0x98] sm:$0xff] %vm388_vm0, %v1645_v28 }
 0x15c   : > { %v1257_v9 = vmul.f32 %v1994_v55, %v3065_v8  ;;  %1995 = vrsqrt.f32 %v3087_v13  ;;  %v3099_v61 = vmax.f32 %v1004_v26, 1e-16  ;;  %v1502_v20 = vsel %vm1464_vm5, %v1402_v17, %v1470_v40  ;;  %vm1104_vm10 = vmor %vm1102_vm9, %vm1103_vm7 }
 0x15d   : > { %v1098_v57 = vmul.f32 %v1992_v23, %v1097_v15  ;;  %v1255_v19 = vsel %vm1254_vm6, %v1990_v59, %v1251_v41  ;;  %1534 = vst [vmem:[%s2855_s15 + $0x20] sm:$0xff] %v1502_v20  ;;  %vm1263_vm8 = vweird.f32 %v1994_v55  ;;  %v1471_v17 = vsel %vm1465_vm4, %v1435_v27, 0.0 }
 0x15e   : > { %v1258_v58 = vmul.f32 %v1994_v55, %v1257_v9  ;;  %v1596_v2 = vpop.f32.mrf.mxu1  ;;  %v1386_v62 = vmul.f32 %v1255_v19, %v2959_v14  ;;  %1997 = vrsqrt.f32 %v3099_v61  ;;  %vm1264_vm12 = vmor %vm1262_vm11, %vm1263_vm8  ;;  %v1487_v8 = vsel %vm1465_vm4, %v1451_v31, 0.0 }
 0x15f   : > { %v1099_v25 = vmul.f32 0.5, %v1098_v57  ;;  %v3106_v47 = vpop.xlane.xlu1 %652  ;;  %v3108_v3 = vpop.xlane.xlu2 %700  ;;  %v1597_v59 = vadd.f32 %v2995_v46, %v1596_v2  ;;  %vm1112_vm14 = vweird.f32 %v3087_v13  ;;  %vm1272_vm2 = vweird.f32 %v3099_v61 }
 0x160   : > { %v1259_v21 = vmul.f32 0.5, %v1258_v58  ;;  %v1418_v12 = vmul.f32 10.0, %v1386_v62  ;;  %v1647_v26 = vpop.f32.mrf.mxu3 }
 0x161   : > { %v1100_v39 = vsub.f32 1.5, %v1099_v25  ;;  %v781_v14 = vpop.xlane.xlu0 %780  ;;  %1686 = vst.msk [vmem:[%s3013_s19 + $0x18] sm:$0xff] %vm388_vm0, %v1597_v59 }
 0x162   : > { %v1260_v22 = vsub.f32 1.5, %v1259_v21  ;;  %v989_v60 = vmul.f32 %v2616_v63, %v781_v14  ;;  %v1996_v1 = vpop.eup %1995  ;;  %v1518_v48 = vsel %vm1464_vm5, %v1418_v12, %v1486_v43  ;;  %v1436_v12 = vmul.f32 0.17677669, %v3059_v44 }
 0x163   : > { %v1101_v51 = vmul.f32 %v1992_v23, %v1100_v39  ;;  %1550 = vst [vmem:[%s2855_s15 + $0xa0] sm:$0xff] %v1518_v48  ;;  %v1107_v63 = vmul.f32 %v1996_v1, %v3087_v13  ;;  %vm1113_vm13 = vweird.f32 %v1996_v1 }
 0x164   : > { %v1261_v11 = vmul.f32 %v1994_v55, %v1260_v22  ;;  %v3128_v7 = vmax.f32 %v989_v60, 1e-16  ;;  %v1998_v49 = vpop.eup %1997  ;;  %vm1114_vm1 = vmor %vm1112_vm14, %vm1113_vm13  ;;  %v1452_v22 = vmul.f32 0.17677669, %v3078_v53 }
 0x165   : > { %v1105_v0 = vsel %vm1104_vm10, %v1992_v23, %v1101_v51  ;;  %v1108_v35 = vmul.f32 %v1996_v1, %v1107_v63  ;;  %v1267_v34 = vmul.f32 %v1998_v49, %v3099_v61  ;;  %vm1273_vm15 = vweird.f32 %v1998_v49 }
 0x166   : > { %v1371_v4 = vmul.f32 %v1105_v0, %v3019_v33  ;;  %v1265_v50 = vsel %vm1264_vm12, %v1994_v55, %v1261_v11  ;;  %v1599_v15 = vpop.f32.mrf.mxu1  ;;  %1999 = vrsqrt.f32 %v3128_v7  ;;  %vm1274_vm3 = vmor %vm1272_vm2, %vm1273_vm15  ;;  %vm1122_vm7 = vweird.f32 %v3128_v7 }
 0x167   : > { %v1387_v41 = vmul.f32 %v1265_v50, %v3028_v37  ;;  %v829_v23 = vpop.xlane.xlu1 %828  ;;  %v3139_v9 = vpop.xlane.xlu2 %655  ;;  %v1109_v55 = vmul.f32 0.5, %v1108_v35  ;;  %v1268_v40 = vmul.f32 %v1998_v49, %v1267_v34  ;;  %v1600_v58 = vadd.f32 %v2995_v46, %v1599_v15 }
 0x168   : > { %v1403_v33 = vmul.f32 10.0, %v1371_v4  ;;  %v1005_v57 = vmul.f32 %v2722_v38, %v829_v23  ;;  %v1648_v37 = vadd.f32 %v2995_v46, %v1647_v26  ;;  %v1650_v27 = vpop.f32.mrf.mxu3  ;;  %v1472_v4 = vsel %vm1465_vm4, %v1436_v12, 0.0 }
 0x169   : > { %v1419_v20 = vmul.f32 10.0, %v1387_v41  ;;  %v3142_v19 = vpop.xlane.xlu0 %703  ;;  %v1110_v24 = vsub.f32 1.5, %v1109_v55  ;;  %v1269_v62 = vmul.f32 0.5, %v1268_v40  ;;  %1687 = vst.msk [vmem:[%s3013_s19 + $0x20] sm:$0xff] %vm388_vm0, %v1600_v58  ;;  %v1651_v61 = vadd.f32 %v2995_v46, %v1650_v27 }
 0x16a   : > { %v1503_v2 = vsel %vm1464_vm5, %v1403_v33, %v1471_v17  ;;  %v3148_v25 = vmax.f32 %v1005_v57, 1e-16  ;;  %1703 = vst.msk [vmem:[%s3013_s19 + $0xa0] sm:$0xff] %vm388_vm0, %v1648_v37  ;;  %v1453_v27 = vmul.f32 0.17677669, %v3108_v3 }
 0x16b   : > { %1535 = vst [vmem:[%s2855_s15 + $0x28] sm:$0xff] %v1503_v2  ;;  %v1519_v38 = vsel %vm1464_vm5, %v1419_v20, %v1487_v8  ;;  %v1111_v43 = vmul.f32 %v1996_v1, %v1110_v24  ;;  %v1270_v21 = vsub.f32 1.5, %v1269_v62  ;;  %v1437_v24 = vmul.f32 0.17677669, %v3106_v47 }
 0x16c   : > { %1551 = vst [vmem:[%s2855_s15 + $0xa8] sm:$0xff] %v1519_v38  ;;  %2001 = vrsqrt.f32 %v3148_v25  ;;  %v2000_v59 = vpop.eup %1999  ;;  %vm1282_vm10 = vweird.f32 %v3148_v25 }
 0x16d   : > { %v1115_v39 = vsel %vm1114_vm1, %v1996_v1, %v1111_v43  ;;  %v1271_v14 = vmul.f32 %v1998_v49, %v1270_v21  ;;  %v1117_v28 = vmul.f32 %v2000_v59, %v3128_v7  ;;  %1704 = vst.msk [vmem:[%s3013_s19 + $0xa8] sm:$0xff] %vm388_vm0, %v1651_v61  ;;  %vm1123_vm6 = vweird.f32 %v2000_v59 }
 0x16e   : > { %v1602_v13 = vpop.f32.mrf.mxu1  ;;  %v1372_v60 = vmul.f32 %v1115_v39, %v3059_v44  ;;  %vm1124_vm8 = vmor %vm1122_vm7, %vm1123_vm6 }
 0x16f   : > { %v784_v48 = vpop.xlane.xlu1 %783  ;;  %v832_v31 = vpop.xlane.xlu2 %831  ;;  %v1603_v1 = vadd.f32 %v2995_v46, %v1602_v13  ;;  %v1275_v51 = vsel %vm1274_vm3, %v1998_v49, %v1271_v14  ;;  %v1118_v11 = vmul.f32 %v2000_v59, %v1117_v28 }
 0x170   : > { %v990_v63 = vmul.f32 %v2632_v10, %v784_v48  ;;  %v1006_v0 = vmul.f32 %v2736_v54, %v832_v31  ;;  %v1404_v44 = vmul.f32 10.0, %v1372_v60  ;;  %v1388_v50 = vmul.f32 %v1275_v51, %v3078_v53  ;;  %v1653_v40 = vpop.f32.mrf.mxu3 }
 0x171   : > { %v3174_v35 = vpop.xlane.xlu0 %658  ;;  %1688 = vst.msk [vmem:[%s3013_s19 + $0x28] sm:$0xff] %vm388_vm0, %v1603_v1  ;;  %v1119_v15 = vmul.f32 0.5, %v1118_v11  ;;  %v1488_v53 = vsel %vm1465_vm4, %v1452_v22, 0.0  ;;  %v1654_v2 = vadd.f32 %v2995_v46, %v1653_v40 }
 0x172   : > { %v2002_v34 = vpop.eup %2001  ;;  %v3178_v49 = vmax.f32 %v990_v63, 1e-16  ;;  %v3180_v26 = vmax.f32 %v1006_v0, 1e-16  ;;  %v1504_v10 = vsel %vm1464_vm5, %v1404_v44, %v1472_v4  ;;  %v1420_v54 = vmul.f32 10.0, %v1388_v50 }
 0x173   : > { %v1277_v17 = vmul.f32 %v2002_v34, %v3148_v25  ;;  %1536 = vst [vmem:[%s2855_s15 + $0x30] sm:$0xff] %v1504_v10  ;;  %v1120_v8 = vsub.f32 1.5, %v1119_v15  ;;  %vm1283_vm9 = vweird.f32 %v2002_v34 }
 0x174   : > { %2003 = vrsqrt.f32 %v3178_v49  ;;  %v1520_v41 = vsel %vm1464_vm5, %v1420_v54, %v1488_v53  ;;  %1705 = vst.msk [vmem:[%s3013_s19 + $0xb0] sm:$0xff] %vm388_vm0, %v1654_v2  ;;  %vm1284_vm11 = vmor %vm1282_vm10, %vm1283_vm9  ;;  %v1438_v53 = vmul.f32 0.17677669, %v3139_v9  ;;  %vm1132_vm14 = vweird.f32 %v3178_v49 }
 0x175   : > { %v1278_v23 = vmul.f32 %v2002_v34, %v1277_v17  ;;  %2005 = vrsqrt.f32 %v3180_v26  ;;  %1552 = vst [vmem:[%s2855_s15 + $0xb0] sm:$0xff] %v1520_v41  ;;  %v1121_v33 = vmul.f32 %v2000_v59, %v1120_v8  ;;  %vm1292_vm1 = vweird.f32 %v3180_v26 }
 0x176   : > { %v1605_v55 = vpop.f32.mrf.mxu1 }
 0x177   : > { %v1279_v57 = vmul.f32 0.5, %v1278_v23  ;;  %v3196_v20 = vpop.xlane.xlu1 %706  ;;  %v787_v58 = vpop.xlane.xlu2 %786  ;;  %v1606_v37 = vadd.f32 %v2995_v46, %v1605_v55  ;;  %v1125_v62 = vsel %vm1124_vm8, %v2000_v59, %v1121_v33  ;;  %v1454_v55 = vmul.f32 0.17677669, %v3142_v19 }
 0x178   : > { %v991_v38 = vmul.f32 %v2644_v52, %v787_v58  ;;  %v1373_v7 = vmul.f32 %v1125_v62, %v3106_v47  ;;  %v1473_v47 = vsel %vm1465_vm4, %v1437_v24, 0.0  ;;  %v1656_v51 = vpop.f32.mrf.mxu3 }
 0x179   : > { %v1280_v43 = vsub.f32 1.5, %v1279_v57  ;;  %v835_v21 = vpop.xlane.xlu0 %834  ;;  %1689 = vst.msk [vmem:[%s3013_s19 + $0x30] sm:$0xff] %vm388_vm0, %v1606_v37  ;;  %v1657_v10 = vadd.f32 %v2995_v46, %v1656_v51 }
 0x17a   : > { %v2004_v12 = vpop.eup %2003  ;;  %v3205_v39 = vmax.f32 %v991_v38, 1e-16  ;;  %v1007_v14 = vmul.f32 %v2724_v18, %v835_v21  ;;  %v1405_v13 = vmul.f32 10.0, %v1373_v7  ;;  %v1474_v7 = vsel %vm1465_vm4, %v1438_v53, 0.0 }
 0x17b   : > { %v2006_v28 = vpop.eup %2005  ;;  %v1281_v59 = vmul.f32 %v2002_v34, %v1280_v43  ;;  %v1127_v52 = vmul.f32 %v2004_v12, %v3178_v49  ;;  %vm1133_vm12 = vweird.f32 %v2004_v12  ;;  %1706 = vst.msk [vmem:[%s3013_s19 + $0xb8] sm:$0xff] %vm388_vm0, %v1657_v10 }
 0x17c   : > { %v1287_v22 = vmul.f32 %v2006_v28, %v3180_v26  ;;  %2007 = vrsqrt.f32 %v3205_v39  ;;  %v1505_v18 = vsel %vm1464_vm5, %v1405_v13, %v1473_v47  ;;  %v3219_v31 = vmax.f32 %v1007_v14, 1e-16  ;;  %vm1134_vm15 = vmor %vm1132_vm14, %vm1133_vm12 }
 0x17d   : > { %v1285_v60 = vsel %vm1284_vm11, %v2002_v34, %v1281_v59  ;;  %v1128_v48 = vmul.f32 %v2004_v12, %v1127_v52  ;;  %1537 = vst [vmem:[%s2855_s15 + $0x38] sm:$0xff] %v1505_v18  ;;  %v1489_v34 = vsel %vm1465_vm4, %v1453_v27, 0.0  ;;  %vm1293_vm13 = vweird.f32 %v2006_v28 }
 0x17e   : > { %v1389_v25 = vmul.f32 %v1285_v60, %v3108_v3  ;;  %v1288_v1 = vmul.f32 %v2006_v28, %v1287_v22  ;;  %v1608_v61 = vpop.f32.mrf.mxu1  ;;  %2009 = vrsqrt.f32 %v3219_v31  ;;  %vm1294_vm2 = vmor %vm1292_vm1, %vm1293_vm13  ;;  %vm1142_vm6 = vweird.f32 %v3205_v39 }
 0x17f   : > { %v1129_v11 = vmul.f32 0.5, %v1128_v48  ;;  %v3224_v63 = vpop.xlane.xlu1 %661  ;;  %v3226_v0 = vpop.xlane.xlu2 %709  ;;  %v1609_v4 = vadd.f32 %v2995_v46, %v1608_v61  ;;  %v1439_v61 = vmul.f32 0.17677669, %v3174_v35  ;;  %vm1302_vm9 = vweird.f32 %v3219_v31 }
 0x180   : > { %v1421_v44 = vmul.f32 10.0, %v1389_v25  ;;  %v1289_v50 = vmul.f32 0.5, %v1288_v1  ;;  %v1659_v38 = vpop.f32.mrf.mxu3 }
 0x181   : > { %v1130_v15 = vsub.f32 1.5, %v1129_v11  ;;  %v790_v3 = vpop.xlane.xlu0 %789  ;;  %1690 = vst.msk [vmem:[%s3013_s19 + $0x38] sm:$0xff] %vm388_vm0, %v1609_v4  ;;  %v1660_v60 = vadd.f32 %v2995_v46, %v1659_v38 }
 0x182   : > { %v2008_v54 = vpop.eup %2007  ;;  %v1521_v17 = vsel %vm1464_vm5, %v1421_v44, %v1489_v34  ;;  %v1290_v8 = vsub.f32 1.5, %v1289_v50  ;;  %v992_v33 = vmul.f32 %v2634_v16, %v790_v3  ;;  %v1455_v34 = vmul.f32 0.17677669, %v3196_v20 }
 0x183   : > { %1553 = vst [vmem:[%s2855_s15 + $0xb8] sm:$0xff] %v1521_v17  ;;  %v1131_v41 = vmul.f32 %v2004_v12, %v1130_v15  ;;  %v1137_v23 = vmul.f32 %v2008_v54, %v3205_v39  ;;  %vm1143_vm3 = vweird.f32 %v2008_v54 }
 0x184   : > { %v1291_v40 = vmul.f32 %v2006_v28, %v1290_v8  ;;  %v2010_v57 = vpop.eup %2009  ;;  %v3246_v2 = vmax.f32 %v992_v33, 1e-16  ;;  %vm1144_vm7 = vmor %vm1142_vm6, %vm1143_vm3  ;;  %1707 = vst.msk [vmem:[%s3013_s19 + $0xc0] sm:$0xff] %vm388_vm0, %v1660_v60  ;;  %v1475_v8 = vsel %vm1465_vm4, %v1439_v61, 0.0 }
 0x185   : > { %v1135_v58 = vsel %vm1134_vm15, %v2004_v12, %v1131_v41  ;;  %v1138_v37 = vmul.f32 %v2008_v54, %v1137_v23  ;;  %v1297_v16 = vmul.f32 %v2010_v57, %v3219_v31  ;;  %vm1303_vm8 = vweird.f32 %v2010_v57 }
 0x186   : > { %v1374_v49 = vmul.f32 %v1135_v58, %v3139_v9  ;;  %v1295_v24 = vsel %vm1294_vm2, %v2006_v28, %v1291_v40  ;;  %v1611_v62 = vpop.f32.mrf.mxu1  ;;  %2011 = vrsqrt.f32 %v3246_v2  ;;  %v1490_v9 = vsel %vm1465_vm4, %v1454_v55, 0.0  ;;  %vm1304_vm10 = vmor %vm1302_vm9, %vm1303_vm8 }
 0x187   : > { %v1390_v26 = vmul.f32 %v1295_v24, %v3142_v19  ;;  %v1139_v43 = vmul.f32 0.5, %v1138_v37  ;;  %v838_v21 = vpop.xlane.xlu1 %837  ;;  %v3254_v12 = vpop.xlane.xlu2 %664  ;;  %v1298_v28 = vmul.f32 %v2010_v57, %v1297_v16  ;;  %v1612_v19 = vadd.f32 %v2995_v46, %v1611_v62 }
 0x188   : > { %v1406_v14 = vmul.f32 10.0, %v1374_v49  ;;  %v1008_v13 = vmul.f32 %v2740_v32, %v838_v21  ;;  %v1662_v50 = vpop.f32.mrf.mxu3  ;;  %vm1152_vm12 = vweird.f32 %v3246_v2 }
 0x189   : > { %v1422_v59 = vmul.f32 10.0, %v1390_v26  ;;  %v1140_v52 = vsub.f32 1.5, %v1139_v43  ;;  %v3259_v47 = vpop.xlane.xlu0 %712  ;;  %v1299_v22 = vmul.f32 0.5, %v1298_v28  ;;  %1691 = vst.msk [vmem:[%s3013_s19 + $0x40] sm:$0xff] %vm388_vm0, %v1612_v19  ;;  %v1440_v28 = vmul.f32 0.17677669, %v3224_v63 }
 0x18a   : > { %v1506_v27 = vsel %vm1464_vm5, %v1406_v14, %v1474_v7  ;;  %v3264_v18 = vmax.f32 %v1008_v13, 1e-16 }
 0x18b   : > { %1538 = vst [vmem:[%s2855_s15 + $0x40] sm:$0xff] %v1506_v27  ;;  %v1522_v32 = vsel %vm1464_vm5, %v1422_v59, %v1490_v9  ;;  %v1141_v48 = vmul.f32 %v2008_v54, %v1140_v52  ;;  %v1300_v25 = vsub.f32 1.5, %v1299_v22 }
 0x18c   : > { %1554 = vst [vmem:[%s2855_s15 + $0xc0] sm:$0xff] %v1522_v32  ;;  %2013 = vrsqrt.f32 %v3264_v18  ;;  %v2012_v1 = vpop.eup %2011  ;;  %vm1312_vm15 = vweird.f32 %v3264_v18 }
 0x18d   : > { %v1145_v51 = vsel %vm1144_vm7, %v2008_v54, %v1141_v48  ;;  %v1301_v4 = vmul.f32 %v2010_v57, %v1300_v25  ;;  %v1147_v44 = vmul.f32 %v2012_v1, %v3246_v2  ;;  %vm1153_vm11 = vweird.f32 %v2012_v1 }
 0x18e   : > { %v1375_v11 = vmul.f32 %v1145_v51, %v3174_v35  ;;  %v1614_v39 = vpop.f32.mrf.mxu1  ;;  %v1663_v35 = vadd.f32 %v2995_v46, %v1662_v50  ;;  %vm1154_vm13 = vmor %vm1152_vm12, %vm1153_vm11 }
 0x18f   : > { %v793_v15 = vpop.xlane.xlu1 %792  ;;  %v841_v3 = vpop.xlane.xlu2 %840  ;;  %v1615_v10 = vadd.f32 %v2995_v46, %v1614_v39  ;;  %v1305_v31 = vsel %vm1304_vm10, %v2010_v57, %v1301_v4  ;;  %v1148_v17 = vmul.f32 %v2012_v1, %v1147_v44 }
 0x190   : > { %v1407_v54 = vmul.f32 10.0, %v1375_v11  ;;  %v993_v53 = vmul.f32 %v2649_v56, %v793_v15  ;;  %v1391_v41 = vmul.f32 %v1305_v31, %v3196_v20  ;;  %v1009_v23 = vmul.f32 %v2753_v36, %v841_v3  ;;  %1708 = vst.msk [vmem:[%s3013_s19 + $0xc8] sm:$0xff] %vm388_vm0, %v1663_v35  ;;  %v1665_v7 = vpop.f32.mrf.mxu3 }
 0x191   : > { %v3289_v33 = vpop.xlane.xlu0 %667  ;;  %1692 = vst.msk [vmem:[%s3013_s19 + $0x48] sm:$0xff] %vm388_vm0, %v1615_v10  ;;  %v1149_v57 = vmul.f32 0.5, %v1148_v17  ;;  %v1491_v36 = vsel %vm1465_vm4, %v1455_v34, 0.0  ;;  %v1666_v14 = vadd.f32 %v2995_v46, %v1665_v7 }
 0x192   : > { %v2014_v55 = vpop.eup %2013  ;;  %v1507_v40 = vsel %vm1464_vm5, %v1407_v54, %v1475_v8  ;;  %v3295_v58 = vmax.f32 %v993_v53, 1e-16  ;;  %v1423_v56 = vmul.f32 10.0, %v1391_v41  ;;  %v3301_v37 = vmax.f32 %v1009_v23, 1e-16 }
 0x193   : > { %1539 = vst [vmem:[%s2855_s15 + $0x48] sm:$0xff] %v1507_v40  ;;  %v1307_v20 = vmul.f32 %v2014_v55, %v3264_v18  ;;  %v1150_v49 = vsub.f32 1.5, %v1149_v57  ;;  %vm1313_vm14 = vweird.f32 %v2014_v55 }
 0x194   : > { %2015 = vrsqrt.f32 %v3295_v58  ;;  %v1523_v24 = vsel %vm1464_vm5, %v1423_v56, %v1491_v36  ;;  %1709 = vst.msk [vmem:[%s3013_s19 + $0xd0] sm:$0xff] %vm388_vm0, %v1666_v14  ;;  %vm1314_vm1 = vmor %vm1312_vm15, %vm1313_vm14  ;;  %vm1162_vm6 = vweird.f32 %v3295_v58  ;;  %v1441_v56 = vmul.f32 0.17677669, %v3254_v12 }
 0x195   : > { %v1308_v16 = vmul.f32 %v2014_v55, %v1307_v20  ;;  %2017 = vrsqrt.f32 %v3301_v37  ;;  %1555 = vst [vmem:[%s2855_s15 + $0xc8] sm:$0xff] %v1523_v24  ;;  %v1151_v62 = vmul.f32 %v2012_v1, %v1150_v49  ;;  %vm1322_vm8 = vweird.f32 %v3301_v37 }
 0x196   : > { %v1617_v38 = vpop.f32.mrf.mxu1 }
 0x197   : > { %v1309_v26 = vmul.f32 0.5, %v1308_v16  ;;  %v3311_v43 = vpop.xlane.xlu1 %715  ;;  %v796_v21 = vpop.xlane.xlu2 %795  ;;  %v1618_v9 = vadd.f32 %v2995_v46, %v1617_v38  ;;  %v1155_v13 = vsel %vm1154_vm13, %v2012_v1, %v1151_v62  ;;  %v1456_v1 = vmul.f32 0.17677669, %v3226_v0 }
 0x198   : > { %v994_v59 = vmul.f32 %v2662_v6, %v796_v21  ;;  %v1376_v2 = vmul.f32 %v1155_v13, %v3224_v63  ;;  %v1476_v63 = vsel %vm1465_vm4, %v1440_v28, 0.0  ;;  %v1668_v50 = vpop.f32.mrf.mxu3  ;;  %v1477_v28 = vsel %vm1465_vm4, %v1441_v56, 0.0 }
 0x199   : > { %v1310_v52 = vsub.f32 1.5, %v1309_v26  ;;  %v844_v19 = vpop.xlane.xlu0 %843  ;;  %1693 = vst.msk [vmem:[%s3013_s19 + $0x50] sm:$0xff] %vm388_vm0, %v1618_v9  ;;  %v1492_v31 = vsel %vm1465_vm4, %v1456_v1, 0.0  ;;  %v1669_v53 = vadd.f32 %v2995_v46, %v1668_v50  ;;  %v1442_v1 = vmul.f32 0.17677669, %v3289_v33 }
 0x19a   : > { %v2016_v27 = vpop.eup %2015  ;;  %v3320_v22 = vmax.f32 %v994_v59, 1e-16  ;;  %v1010_v60 = vmul.f32 %v2742_v30, %v844_v19  ;;  %v1408_v48 = vmul.f32 10.0, %v1376_v2 }
 0x19b   : > { %v2018_v32 = vpop.eup %2017  ;;  %v1311_v25 = vmul.f32 %v2014_v55, %v1310_v52  ;;  %v1157_v6 = vmul.f32 %v2016_v27, %v3295_v58  ;;  %vm1163_vm2 = vweird.f32 %v2016_v27  ;;  %1710 = vst.msk [vmem:[%s3013_s19 + $0xd8] sm:$0xff] %vm388_vm0, %v1669_v53  ;;  %v1457_v58 = vmul.f32 0.17677669, %v3259_v47 }
 0x19c   : > { %v1317_v61 = vmul.f32 %v2018_v32, %v3301_v37  ;;  %2019 = vrsqrt.f32 %v3320_v22  ;;  %v1508_v30 = vsel %vm1464_vm5, %v1408_v48, %v1476_v63  ;;  %v3334_v4 = vmax.f32 %v1010_v60, 1e-16  ;;  %vm1164_vm7 = vmor %vm1162_vm6, %vm1163_vm2 }
 0x19d   : > { %v1315_v51 = vsel %vm1314_vm1, %v2014_v55, %v1311_v25  ;;  %v1158_v11 = vmul.f32 %v2016_v27, %v1157_v6  ;;  %1540 = vst [vmem:[%s2855_s15 + $0x50] sm:$0xff] %v1508_v30  ;;  %vm1323_vm3 = vweird.f32 %v2018_v32  ;;  %vm1172_vm11 = vweird.f32 %v3320_v22 }
 0x19e   : > { %v1392_v18 = vmul.f32 %v1315_v51, %v3226_v0  ;;  %v1318_v44 = vmul.f32 %v2018_v32, %v1317_v61  ;;  %v1620_v39 = vpop.f32.mrf.mxu1  ;;  %2021 = vrsqrt.f32 %v3334_v4  ;;  %vm1324_vm9 = vmor %vm1322_vm8, %vm1323_vm3  ;;  %vm1332_vm14 = vweird.f32 %v3334_v4 }
 0x19f   : > { %v1159_v34 = vmul.f32 0.5, %v1158_v11  ;;  %v3339_v15 = vpop.xlane.xlu1 %670  ;;  %v3341_v3 = vpop.xlane.xlu2 %718  ;;  %v1621_v10 = vadd.f32 %v2995_v46, %v1620_v39 }
 0x1a0   : > { %v1424_v35 = vmul.f32 10.0, %v1392_v18  ;;  %v1319_v54 = vmul.f32 0.5, %v1318_v44  ;;  %v1671_v26 = vpop.f32.mrf.mxu3  ;;  %v1458_v44 = vmul.f32 0.17677669, %v3311_v43 }
 0x1a1   : > { %v1160_v17 = vsub.f32 1.5, %v1159_v34  ;;  %v799_v0 = vpop.xlane.xlu0 %798  ;;  %1694 = vst.msk [vmem:[%s3013_s19 + $0x58] sm:$0xff] %vm388_vm0, %v1621_v10  ;;  %v1672_v19 = vadd.f32 %v2995_v46, %v1671_v26 }
 0x1a2   : > { %v2020_v8 = vpop.eup %2019  ;;  %v1524_v41 = vsel %vm1464_vm5, %v1424_v35, %v1492_v31  ;;  %v1320_v23 = vsub.f32 1.5, %v1319_v54  ;;  %v995_v57 = vmul.f32 %v2651_v5, %v799_v0  ;;  %v1478_v31 = vsel %vm1465_vm4, %v1442_v1, 0.0 }
 0x1a3   : > { %1556 = vst [vmem:[%s2855_s15 + $0xd0] sm:$0xff] %v1524_v41  ;;  %v1161_v55 = vmul.f32 %v2016_v27, %v1160_v17  ;;  %v1167_v40 = vmul.f32 %v2020_v8, %v3320_v22  ;;  %vm1173_vm10 = vweird.f32 %v2020_v8 }
 0x1a4   : > { %v1321_v20 = vmul.f32 %v2018_v32, %v1320_v23  ;;  %v2022_v36 = vpop.eup %2021  ;;  %v3359_v16 = vmax.f32 %v995_v57, 1e-16  ;;  %vm1174_vm12 = vmor %vm1172_vm11, %vm1173_vm10  ;;  %1711 = vst.msk [vmem:[%s3013_s19 + $0xe0] sm:$0xff] %vm388_vm0, %v1672_v19 }
 0x1a5   : > { %v1165_v49 = vsel %vm1164_vm7, %v2016_v27, %v1161_v55  ;;  %v1168_v24 = vmul.f32 %v2020_v8, %v1167_v40  ;;  %v1327_v5 = vmul.f32 %v2022_v36, %v3334_v4  ;;  %v1493_v27 = vsel %vm1465_vm4, %v1457_v58, 0.0 }
 0x1a6   : > { %v1377_v62 = vmul.f32 %v1165_v49, %v3254_v12  ;;  %v1325_v38 = vsel %vm1324_vm9, %v2018_v32, %v1321_v20  ;;  %v1623_v7 = vpop.f32.mrf.mxu1  ;;  %2023 = vrsqrt.f32 %v3359_v16  ;;  %vm1333_vm13 = vweird.f32 %v2022_v36 }
 0x1a7   : > { %v1393_v21 = vmul.f32 %v1325_v38, %v3259_v47  ;;  %v1169_v37 = vmul.f32 0.5, %v1168_v24  ;;  %v3366_v9 = vpop.xlane.xlu1 %846  ;;  %v3368_v14 = vpop.xlane.xlu2 %673  ;;  %v1328_v13 = vmul.f32 %v2022_v36, %v1327_v5  ;;  %v1624_v59 = vadd.f32 %v2995_v46, %v1623_v7  ;;  %vm1334_vm15 = vmor %vm1332_vm14, %vm1333_vm13 }
 0x1a8   : > { %v1409_v12 = vmul.f32 10.0, %v1377_v62  ;;  %v1674_v22 = vpop.f32.mrf.mxu3  ;;  %vm1182_vm2 = vweird.f32 %v3359_v16  ;;  %v1443_v58 = vmul.f32 0.17677669, %v3339_v15 }
 0x1a9   : > { %v1425_v2 = vmul.f32 10.0, %v1393_v21  ;;  %v1170_v52 = vsub.f32 1.5, %v1169_v37  ;;  %v3373_v47 = vpop.xlane.xlu0 %721  ;;  %v1329_v32 = vmul.f32 0.5, %v1328_v13  ;;  %1695 = vst.msk [vmem:[%s3013_s19 + $0x60] sm:$0xff] %vm388_vm0, %v1624_v59  ;;  %v1675_v10 = vadd.f32 %v2995_v46, %v1674_v22 }
 0x1aa   : > { %v1509_v60 = vsel %vm1464_vm5, %v1409_v12, %v1477_v28  ;;  %v1479_v28 = vsel %vm1465_vm4, %v1443_v58, 0.0 }
 0x1ab   : > { %1541 = vst [vmem:[%s2855_s15 + $0x58] sm:$0xff] %v1509_v60  ;;  %v1525_v48 = vsel %vm1464_vm5, %v1425_v2, %v1493_v27  ;;  %v1171_v25 = vmul.f32 %v2020_v8, %v1170_v52  ;;  %v1330_v6 = vsub.f32 1.5, %v1329_v32 }
 0x1ac   : > { %1557 = vst [vmem:[%s2855_s15 + $0xd8] sm:$0xff] %v1525_v48  ;;  %v2024_v63 = vpop.eup %2023 }
 0x1ad   : > { %v1175_v61 = vsel %vm1174_vm12, %v2020_v8, %v1171_v25  ;;  %v1331_v51 = vmul.f32 %v2022_v36, %v1330_v6  ;;  %v1177_v11 = vmul.f32 %v2024_v63, %v3359_v16  ;;  %1712 = vst.msk [vmem:[%s3013_s19 + $0xe8] sm:$0xff] %vm388_vm0, %v1675_v10  ;;  %vm1183_vm1 = vweird.f32 %v2024_v63 }
 0x1ae   : > { %v1378_v30 = vmul.f32 %v1175_v61, %v3289_v33  ;;  %v1626_v18 = vpop.f32.mrf.mxu1  ;;  %vm1184_vm3 = vmor %vm1182_vm2, %vm1183_vm1 }
 0x1af   : > { %v802_v39 = vpop.xlane.xlu1 %801  ;;  %v850_v50 = vpop.xlane.xlu2 %849  ;;  %v1627_v34 = vadd.f32 %v2995_v46, %v1626_v18  ;;  %v1335_v35 = vsel %vm1334_vm15, %v2022_v36, %v1331_v51  ;;  %v1178_v54 = vmul.f32 %v2024_v63, %v1177_v11  ;;  %v2035_v36 = vld [vmem:[%s3511_s5] ss:$0 sm:$0xff]  ;;  %v1444_v18 = vmul.f32 0.17677669, %v3368_v14 }
 0x1b0   : > { %v1410_v33 = vmul.f32 10.0, %v1378_v30  ;;  %v996_v4 = vmul.f32 %v2665_v29, %v802_v39  ;;  %v1394_v17 = vmul.f32 %v1335_v35, %v3311_v43  ;;  %v1494_v29 = vsel %vm1465_vm4, %v1458_v44, 0.0  ;;  %v1677_v57 = vpop.f32.mrf.mxu3 }
 0x1b1   : > { %v3400_v0 = vpop.xlane.xlu0 %676  ;;  %1696 = vst.msk [vmem:[%s3013_s19 + $0x68] sm:$0xff] %vm388_vm0, %v1627_v34  ;;  %v1179_v8 = vmul.f32 0.5, %v1178_v54  ;;  %v1678_v24 = vadd.f32 %v2035_v36, %v1677_v57 }
 0x1b2   : > { %v1510_v53 = vsel %vm1464_vm5, %v1410_v33, %v1478_v31  ;;  %v1028_v46 = vmax.f32 %v996_v4, 1e-16  ;;  %v1426_v41 = vmul.f32 10.0, %v1394_v17 }
 0x1b3   : > { %1542 = vst [vmem:[%s2855_s15 + $0x60] sm:$0xff] %v1510_v53  ;;  %v1180_v23 = vsub.f32 1.5, %v1179_v8  ;;  %v1445_v53 = vmul.f32 0.17677669, %v3400_v0 }
 0x1b4   : > { %2025 = vrsqrt.f32 %v1028_v46  ;;  %v1526_v43 = vsel %vm1464_vm5, %v1426_v41, %v1494_v29  ;;  %1713 = vst.msk [vmem:[%s3013_s19 + $0xf0] sm:$0xff] %vm388_vm0, %v1678_v24  ;;  %vm1192_vm7 = vweird.f32 %v1028_v46 }
 0x1b5   : > { %1558 = vst [vmem:[%s2855_s15 + $0xe0] sm:$0xff] %v1526_v43  ;;  %v1181_v55 = vmul.f32 %v2024_v63, %v1180_v23 }
 0x1b6   : > { %v1629_v40 = vpop.f32.mrf.mxu1 }
 0x1b7   : > { %v3415_v56 = vpop.xlane.xlu1 %724  ;;  %v805_v20 = vpop.xlane.xlu2 %804  ;;  %v1630_v49 = vadd.f32 %v2035_v36, %v1629_v40  ;;  %v1185_v62 = vsel %vm1184_vm3, %v2024_v63, %v1181_v55 }
 0x1b8   : > { %v997_v38 = vmul.f32 %v2680_v42, %v805_v20  ;;  %v1379_v16 = vmul.f32 %v1185_v62, %v3339_v15  ;;  %v1680_v13 = vpop.f32.mrf.mxu3  ;;  %v1481_v20 = vsel %vm1465_vm4, %v1445_v53, 0.0 }
 0x1b9   : > { %v853_v5 = vpop.xlane.xlu0 %852  ;;  %1697 = vst.msk [vmem:[%s3013_s19 + $0x70] sm:$0xff] %vm388_vm0, %v1630_v49  ;;  %v1681_v27 = vadd.f32 %v2035_v36, %v1680_v13 }
 0x1ba   : > { %v2026_v7 = vpop.eup %2025  ;;  %v1029_v26 = vmax.f32 %v997_v38, 1e-16  ;;  %v1411_v21 = vmul.f32 10.0, %v1379_v16  ;;  %v1460_v16 = vmul.f32 0.17677669, %v3373_v47 }
 0x1bb   : > { %v1187_v37 = vmul.f32 %v2026_v7, %v1028_v46  ;;  %vm1193_vm6 = vweird.f32 %v2026_v7  ;;  %1714 = vst.msk [vmem:[%s3013_s19 + $0xf8] sm:$0xff] %vm388_vm0, %v1681_v27 }
 0x1bc   : > { %2027 = vrsqrt.f32 %v1029_v26  ;;  %v1511_v12 = vsel %vm1464_vm5, %v1411_v21, %v1479_v28  ;;  %vm1194_vm8 = vmor %vm1192_vm7, %vm1193_vm6  ;;  %vm1202_vm9 = vweird.f32 %v1029_v26  ;;  %v1459_v28 = vmul.f32 0.17677669, %v3341_v3 }
 0x1bd   : > { %v1188_v42 = vmul.f32 %v2026_v7, %v1187_v37  ;;  %1543 = vst [vmem:[%s2855_s15 + $0x68] sm:$0xff] %v1511_v12 }
 0x1be   : > { %v1632_v15 = vpop.f32.mrf.mxu1 }
 0x1bf   : > { %v1189_v59 = vmul.f32 0.5, %v1188_v42  ;;  %v978_v2 = vpop.xlane.xlu1 %977  ;;  %v981_v52 = vpop.xlane.xlu2 %980  ;;  %v1633_v19 = vadd.f32 %v2035_v36, %v1632_v15 }
 0x1c0   : > { %v1012_v60 = vmul.f32 %v978_v2, %v850_v50  ;;  %v1013_v32 = vmul.f32 %v981_v52, %v853_v5 }
 0x1c1   : > { %v1190_v48 = vsub.f32 1.5, %v1189_v59  ;;  %v975_v25 = vpop.xlane.xlu0 %974  ;;  %1698 = vst.msk [vmem:[%s3013_s19 + $0x78] sm:$0xff] %vm388_vm0, %v1633_v19  ;;  %v1496_v59 = vsel %vm1465_vm4, %v1460_v16, 0.0  ;;  %v1495_v19 = vsel %vm1465_vm4, %v1459_v28, 0.0 }
 0x1c2   : > { %v2028_v6 = vpop.eup %2027  ;;  %v1044_v63 = vmax.f32 %v1012_v60, 1e-16  ;;  %v1045_v1 = vmax.f32 %v1013_v32, 1e-16  ;;  %v1011_v61 = vmul.f32 %v975_v25, %v3366_v9  ;;  %v1480_v9 = vsel %vm1465_vm4, %v1444_v18, 0.0 }
 0x1c3   : > { %v1191_v30 = vmul.f32 %v2026_v7, %v1190_v48  ;;  %v1197_v51 = vmul.f32 %v2028_v6, %v1029_v26  ;;  %vm1203_vm0 = vweird.f32 %v2028_v6  ;;  %v1461_v26 = vmul.f32 0.17677669, %v3415_v56 }
 0x1c4   : > { %2029 = vrsqrt.f32 %v1044_v63  ;;  %v1043_v11 = vmax.f32 %v1011_v61, 1e-16  ;;  %vm1204_vm10 = vmor %vm1202_vm9, %vm1203_vm0  ;;  %vm1352_vm13 = vweird.f32 %v1044_v63  ;;  %vm1362_vm1 = vweird.f32 %v1045_v1 }
 0x1c5   : > { %v1195_v22 = vsel %vm1194_vm8, %v2026_v7, %v1191_v30  ;;  %v1198_v44 = vmul.f32 %v2028_v6, %v1197_v51  ;;  %2031 = vrsqrt.f32 %v1045_v1  ;;  %v1497_v2 = vsel %vm1465_vm4, %v1461_v26, 0.0 }
 0x1c6   : > { %v1380_v39 = vmul.f32 %v1195_v22, %v3368_v14  ;;  %2033 = vrsqrt.f32 %v1043_v11  ;;  %vm1342_vm3 = vweird.f32 %v1043_v11 }
 0x1c7   : > { %v1199_v50 = vmul.f32 0.5, %v1198_v44 }
 0x1c8   : > { %v1412_v34 = vmul.f32 10.0, %v1380_v39 }
 0x1c9   : > { %v1200_v10 = vsub.f32 1.5, %v1199_v50 }
 0x1ca   : > { %v2030_v33 = vpop.eup %2029  ;;  %v1512_v35 = vsel %vm1464_vm5, %v1412_v34, %v1480_v9 }
 0x1cb   : > { %v2032_v54 = vpop.eup %2031  ;;  %1544 = vst [vmem:[%s2855_s15 + $0x70] sm:$0xff] %v1512_v35  ;;  %v1201_v4 = vmul.f32 %v2028_v6, %v1200_v10  ;;  %v1347_v31 = vmul.f32 %v2030_v33, %v1044_v63  ;;  %vm1353_vm11 = vweird.f32 %v2030_v33 }
 0x1cc   : > { %v2034_v17 = vpop.eup %2033  ;;  %v1357_v14 = vmul.f32 %v2032_v54, %v1045_v1  ;;  %vm1363_vm12 = vweird.f32 %v2032_v54  ;;  %vm1354_vm15 = vmor %vm1352_vm13, %vm1353_vm11 }
 0x1cd   : > { %v1205_v8 = vsel %vm1204_vm10, %v2028_v6, %v1201_v4  ;;  %v1348_v46 = vmul.f32 %v2030_v33, %v1347_v31  ;;  %v1337_v41 = vmul.f32 %v2034_v17, %v1043_v11  ;;  %vm1343_vm14 = vweird.f32 %v2034_v17  ;;  %vm1364_vm2 = vmor %vm1362_vm1, %vm1363_vm12 }
 0x1ce   : > { %v1381_v29 = vmul.f32 %v1205_v8, %v3400_v0  ;;  %v1358_v23 = vmul.f32 %v2032_v54, %v1357_v14  ;;  %vm1344_vm6 = vmor %vm1342_vm3, %vm1343_vm14 }
 0x1cf   : > { %v1349_v43 = vmul.f32 0.5, %v1348_v46  ;;  %v1338_v55 = vmul.f32 %v2034_v17, %v1337_v41 }
 0x1d0   : > { %v1413_v40 = vmul.f32 10.0, %v1381_v29  ;;  %v1359_v57 = vmul.f32 0.5, %v1358_v23 }
 0x1d1   : > { %v1350_v36 = vsub.f32 1.5, %v1349_v43  ;;  %v1339_v49 = vmul.f32 0.5, %v1338_v55 }
 0x1d2   : > { %v1513_v24 = vsel %vm1464_vm5, %v1413_v40, %v1481_v20  ;;  %v1360_v58 = vsub.f32 1.5, %v1359_v57 }
 0x1d3   : > { %1545 = vst [vmem:[%s2855_s15 + $0x78] sm:$0xff] %v1513_v24  ;;  %v1351_v62 = vmul.f32 %v2030_v33, %v1350_v36  ;;  %v1340_v0 = vsub.f32 1.5, %v1339_v49 }
 0x1d4   : > { %v1361_v38 = vmul.f32 %v2032_v54, %v1360_v58 }
 0x1d5   : > { %v1355_v5 = vsel %vm1354_vm15, %v2030_v33, %v1351_v62  ;;  %v1341_v7 = vmul.f32 %v2034_v17, %v1340_v0 }
 0x1d6   : > { %v1396_v21 = vmul.f32 %v1355_v5, %v3373_v47  ;;  %v1365_v37 = vsel %vm1364_vm2, %v2032_v54, %v1361_v38 }
 0x1d7   : > { %v1397_v12 = vmul.f32 %v1365_v37, %v3415_v56  ;;  %v1345_v42 = vsel %vm1344_vm6, %v2034_v17, %v1341_v7 }
 0x1d8   : > { %v1428_v15 = vmul.f32 10.0, %v1396_v21  ;;  %v1395_v13 = vmul.f32 %v1345_v42, %v3341_v3 }
 0x1d9   : > { %v1429_v47 = vmul.f32 10.0, %v1397_v12 }
 0x1da   : > { %v1528_v56 = vsel %vm1464_vm5, %v1428_v15, %v1496_v59  ;;  %v1427_v52 = vmul.f32 10.0, %v1395_v13 }
 0x1db   : > { %1560 = vst [vmem:[%s2855_s15 + $0xf0] sm:$0xff] %v1528_v56  ;;  %v1529_v3 = vsel %vm1464_vm5, %v1429_v47, %v1497_v2 }
 0x1dc   : > { %1561 = vst [vmem:[%s2855_s15 + $0xf8] sm:$0xff] %v1529_v3  ;;  %v1527_v27 = vsel %vm1464_vm5, %v1427_v52, %v1495_v19 }
 0x1dd   : > { %1559 = vst [vmem:[%s2855_s15 + $0xe8] sm:$0xff] %v1527_v27 }
 0x1de   : > { %2063 = shalt.err (!%p2060_p3)
}
 0x1df   : > { %s2100_s9 = smov 128   ;;  %s2101_s15 = smov 8  }
 0x1e0   : > { %1928 = dma.vmem_to_hbm [thread:$0]  (%p2180_p5), %s1734_s28, 4096, %s1736_s13, %s1716_s14, %s2100_s9, %s2100_s9, %s2101_s15  }
 0x1e1 PF: > { %p1934_p4 = scmp.ge.s32.totalorder %s2098_s27, 2  ;;  %s1754_s23 = sand.u32 1, %s2086_s24  }
 0x1e2   : > { %s1755_s29 = scalar_lea.sflag [#allocation3], %s1754_s23 }
 0x1e3   : > { %p1931_p7 = pnand %p1934_p4, %p2184_p6 }
 0x1e5   : > { %p1932_p8 = pneg %p1931_p7 }
 0x1e7   : > { %2081 = dma.done.wait (%p1932_p8), %s1755_s29, 4096  }
 0x1e8   : > { %2083 = vsyncadd (%p1932_p8), %s1755_s29, 4294963200  ;;  %p18_p9 = scmp.ge.s32.totalorder %s2167_s30, 4   ;;  %s3553_s24 = smov %s2090_s25 }
 0x1e9   : > { %s3554_s25 = smov %s2094_s26  ;;  %s3555_s26 = smov %s2178_s10 }
 0x1ea   : > { %s3556_s27 = smov %s2167_s30  ;;  %20 = sbr.rel (!%p18_p9) target bundleno = 3 (0x3), region = 94 }
 0x1ef   :  { %1769 = vsyncpa [#allocation3], 1 }
 0x1f0   :  { %1771 = vsyncpa [#allocation3 + $0x1], 1 }

</bundles_post_ra>
